<compile_context>
chip_gen: v6e
topology: v6e:2x2x1
jax: 0.10.0
libtpu: 0.0.40
codegen_flags: <defaults>
</compile_context>

<pallas_src>
import math
import functools

import numpy as np
import jax
import jax.numpy as jnp
from jax.experimental import pallas as pl
from jax.experimental.pallas import tpu as pltpu


# ---------------------------------------------------------------------------
# Small helpers
# ---------------------------------------------------------------------------

def _round_up(x, m):
    return ((x + m - 1) // m) * m


def _choose_lane_block(dim, target):
    """Largest multiple-of-128 divisor of `dim` <= target (else dim itself)."""
    if dim <= target:
        return dim
    b = (target // 128) * 128
    while b >= 128:
        if dim % b == 0:
            return b
        b -= 128
    return dim


def _choose_sub_block(dim, target):
    """Largest multiple-of-8 divisor of `dim` <= target (else dim itself)."""
    if dim <= target:
        return dim
    b = (target // 8) * 8
    while b >= 8:
        if dim % b == 0:
            return b
        b -= 8
    return dim


def _pad_rows(a, rows):
    """Zero-pad axis 0 of `a` up to `rows` rows."""
    if a.shape[0] == rows:
        return a
    pad = [(0, rows - a.shape[0])] + [(0, 0)] * (a.ndim - 1)
    return jnp.pad(a, pad)


# ---------------------------------------------------------------------------
# Kernel 1: batched dense matmul  res[k] = A3[k] @ A4[k]   (bf16 in, f32 out)
# ---------------------------------------------------------------------------

def _bmm_kernel(a_ref, b_ref, o_ref, acc_ref):
    @pl.when(pl.program_id(3) == 0)
    def _():
        acc_ref[...] = jnp.zeros_like(acc_ref)

    acc_ref[...] += jnp.dot(a_ref[0], b_ref[0],
                            preferred_element_type=jnp.float32)

    @pl.when(pl.program_id(3) == pl.num_programs(3) - 1)
    def _():
        o_ref[0] = acc_ref[...]


def batched_matmul(A, B):
    """A, B: (K, N, N) bf16 (N a multiple of 128) -> (K, N, N) f32."""
    K, N, _ = A.shape
    tm = _choose_sub_block(N, 256)
    tn = _choose_lane_block(N, 256)
    tk = _choose_lane_block(N, 512)
    return pl.pallas_call(
        _bmm_kernel,
        out_shape=jax.ShapeDtypeStruct((K, N, N), jnp.float32),
        grid_spec=pltpu.PrefetchScalarGridSpec(
            num_scalar_prefetch=0,
            grid=(K, N // tm, N // tn, N // tk),
            in_specs=[
                pl.BlockSpec((1, tm, tk), lambda b, i, j, kk: (b, i, kk)),
                pl.BlockSpec((1, tk, tn), lambda b, i, j, kk: (b, kk, j)),
            ],
            out_specs=pl.BlockSpec((1, tm, tn), lambda b, i, j, kk: (b, i, j)),
            scratch_shapes=[pltpu.VMEM((tm, tn), jnp.float32)]),
        compiler_params=pltpu.CompilerParams(
            dimension_semantics=("parallel", "parallel", "parallel",
                                 "arbitrary"),
            vmem_limit_bytes=32 * 1024 * 1024),
    )(A, B)


# ---------------------------------------------------------------------------
# Kernel 2: fused edge-feature assembly + 2-layer MLP (row-parallel over E)
#   h12 = C @ [W1|W2] / ne ;  tmp = [C, h1*h2, diag, mm]
#   Cout = relu(tmp @ Wm1) @ Wm2        (single wide Wm1 dot, K = 3*ne + f5)
# ---------------------------------------------------------------------------

def _edge_mlp_kernel(c_ref, diag_ref, mm_ref, w12_ref, wm1_ref, wm2_ref,
                     o_ref, *, ne, inv_ne):
    c = c_ref[...]
    # One wide MXU dot for L1|L2; the sub-128 lane split is cheap at small ne
    # (keep W1/W2 as separate dots if nedgeinput ever grows past 128).
    h12 = jnp.dot(c, w12_ref[...], preferred_element_type=jnp.float32) * inv_ne
    prod = h12[:, :ne] * h12[:, ne:]
    tmp = jnp.concatenate([c, prod, diag_ref[...], mm_ref[...]], axis=1)
    h = jnp.maximum(
        jnp.dot(tmp, wm1_ref[...], preferred_element_type=jnp.float32), 0.0)
    o_ref[...] = jnp.dot(h, wm2_ref[...], preferred_element_type=jnp.float32)


def fused_edge_mlp(C, diag, mm, W12, Wm1, Wm2, *, nedgeinput):
    E, ne = C.shape
    f5 = diag.shape[1]
    nh = Wm1.shape[1]
    n_out = Wm2.shape[1]
    # Rows are independent: cap the tile at ~E/2 so the parallel grid has
    # >= 2 steps (both v7x TensorCores), and pad E so the tile always divides.
    tE = max(8, min(2048, (max(E // 2, 8) // 8) * 8))
    Ep = _round_up(max(E, tE), tE)
    Cp = _pad_rows(C, Ep)
    dp = _pad_rows(diag, Ep)
    mp = _pad_rows(mm, Ep)
    out = pl.pallas_call(
        functools.partial(_edge_mlp_kernel, ne=ne, inv_ne=1.0 / nedgeinput),
        out_shape=jax.ShapeDtypeStruct((Ep, n_out), jnp.float32),
        grid_spec=pltpu.PrefetchScalarGridSpec(
            num_scalar_prefetch=0, grid=(Ep // tE,),
            in_specs=[
                pl.BlockSpec((tE, ne), lambda i: (i, 0)),
                pl.BlockSpec((tE, f5), lambda i: (i, 0)),
                pl.BlockSpec((tE, ne), lambda i: (i, 0)),
                pl.BlockSpec((ne, 2 * ne), lambda i: (0, 0)),
                pl.BlockSpec((3 * ne + f5, nh), lambda i: (0, 0)),
                pl.BlockSpec((nh, n_out), lambda i: (0, 0)),
            ],
            out_specs=pl.BlockSpec((tE, n_out), lambda i: (i, 0))),
        compiler_params=pltpu.CompilerParams(
            dimension_semantics=("parallel",),
            vmem_limit_bytes=16 * 1024 * 1024),
    )(Cp, dp, mp, W12, Wm1, Wm2)
    return out[:E]


# ---------------------------------------------------------------------------
# Kernel 3: Conv_agg, computed transposed so the output is lane-dense:
#   xout^T = (XWt @ ACt + bias[:, None]) / nnodeinput
#   XWt[o, k*Np + j] = (x @ Wagg[k])[j, o],   ACt[k*Np + j, i] = AC[k, i, j]
# ---------------------------------------------------------------------------

def _agg_kernel(xw_ref, ac_ref, b_ref, o_ref, acc_ref, *, inv_n):
    @pl.when(pl.program_id(1) == 0)
    def _():
        acc_ref[...] = jnp.zeros_like(acc_ref)

    acc_ref[...] += jnp.dot(xw_ref[...], ac_ref[...],
                            preferred_element_type=jnp.float32)

    @pl.when(pl.program_id(1) == pl.num_programs(1) - 1)
    def _():
        o_ref[...] = (acc_ref[...] + b_ref[...]) * inv_n


def conv_agg_matmul_t(XWt, ACt, bias, *, inv_n):
    n_out, KN = XWt.shape
    Np = ACt.shape[1]
    tk = _choose_lane_block(KN, 512)
    tn = _choose_lane_block(Np, 512)
    bias2 = bias.reshape(n_out, 1).astype(jnp.float32)
    return pl.pallas_call(
        functools.partial(_agg_kernel, inv_n=inv_n),
        out_shape=jax.ShapeDtypeStruct((n_out, Np), jnp.float32),
        grid_spec=pltpu.PrefetchScalarGridSpec(
            num_scalar_prefetch=0, grid=(Np // tn, KN // tk),
            in_specs=[
                pl.BlockSpec((n_out, tk), lambda i, k: (0, k)),
                pl.BlockSpec((tk, tn), lambda i, k: (k, i)),
                pl.BlockSpec((n_out, 1), lambda i, k: (0, 0)),
            ],
            out_specs=pl.BlockSpec((n_out, tn), lambda i, k: (0, i)),
            scratch_shapes=[pltpu.VMEM((n_out, tn), jnp.float32)]),
        compiler_params=pltpu.CompilerParams(
            dimension_semantics=("parallel", "arbitrary"),
            vmem_limit_bytes=32 * 1024 * 1024),
    )(XWt, ACt, bias2)


# ---------------------------------------------------------------------------
# Parameter init (deterministic, glorot uniform like the reference)
# ---------------------------------------------------------------------------

def init_params(key, nedgeinput, nedgeoutput, nnodeinput, nnodeoutput):
    def glorot(k, shape):
        std = math.sqrt(6.0 / (shape[-2] + shape[-1]))
        return jax.random.uniform(k, shape, jnp.float32, -std, std)

    f5 = max(nnodeinput, nedgeinput)
    ks = jax.random.split(key, 8)
    return dict(
        W1=glorot(ks[0], (nedgeinput, nedgeinput)),
        W2=glorot(ks[1], (nedgeinput, nedgeinput)),
        W3=glorot(ks[2], (nedgeinput, nedgeinput)),
        W4=glorot(ks[3], (nedgeinput, nedgeinput)),
        W5=glorot(ks[4], (nnodeinput, f5)),
        Wm1=glorot(ks[5], (3 * nedgeinput + f5, 8 * nedgeinput)),
        Wm2=glorot(ks[6], (8 * nedgeinput, nedgeoutput)),
        Wagg=glorot(ks[7], (nedgeoutput, nnodeinput, nnodeoutput)),
        bagg=jnp.zeros((nnodeoutput,), jnp.float32),
    )


# ---------------------------------------------------------------------------
# G2N2Layer forward
# ---------------------------------------------------------------------------

def g2n2_forward(params, x, edge_index, C, batch_node, *, nedgeinput,
                 nnodeinput):
    del batch_node  # only supplies N (times 0) in the reference; N comes from x
    N = x.shape[0]
    E, ne = C.shape
    ei0, ei1 = edge_index[0], edge_index[1]
    Np = _round_up(N, 128)                 # lane-aligned padded node count

    # --- tiny edge linears in XLA (output feeds an XLA scatter anyway) ------
    inv_ne = 1.0 / nedgeinput
    X3 = (C @ params['W3']) * inv_ne
    X4 = (C @ params['W4']) * inv_ne

    # --- dense edge layouts + MXU batched matmul for tmp_matmul -------------
    # TODO(synk): duplicate (i,j) edges follow last-writer-wins dense-scatter
    # semantics, same caveat as the reference's index assignment.
    A3 = jnp.zeros((ne, Np, Np), jnp.bfloat16).at[:, ei0, ei1].set(
        X3.T.astype(jnp.bfloat16))
    A4 = jnp.zeros((ne, Np, Np), jnp.bfloat16).at[:, ei0, ei1].set(
        X4.T.astype(jnp.bfloat16))
    res = batched_matmul(A3, A4)                       # (ne, Np, Np) f32
    tmp_mm = res[:, ei0, ei1].T                        # (E, ne)

    # --- diag term: diag_embed(L5(x)/n_in) gathered at edge positions -------
    h5 = (x @ params['W5']) * (1.0 / nnodeinput)
    tmp_diag = jnp.where((ei0 == ei1)[:, None], h5[ei0], 0.0)

    # --- fused edge MLP (Pallas) ---------------------------------------------
    W12 = jnp.concatenate([params['W1'], params['W2']], axis=1)
    Cout = fused_edge_mlp(C, tmp_diag, tmp_mm, W12, params['Wm1'],
                          params['Wm2'], nedgeinput=nedgeinput)

    # --- Conv_agg (transposed, lane-dense output) ----------------------------
    K = Cout.shape[1]
    n_out = params['Wagg'].shape[2]
    xp = _pad_rows(x, Np)
    XW = jnp.einsum('ni,kio->kno', xp, params['Wagg'])        # (K, Np, n_out)
    XWt = jnp.transpose(XW, (2, 0, 1)).reshape(n_out, K * Np)
    rows = ei1[:, None] + (jnp.arange(K, dtype=ei1.dtype) * Np)[None, :]
    cols = jnp.broadcast_to(ei0[:, None], (E, K))
    ACt = jnp.zeros((K * Np, Np), jnp.float32).at[rows, cols].set(Cout)
    xoutT = conv_agg_matmul_t(XWt, ACt, params['bagg'],
                              inv_n=1.0 / nnodeinput)
    xout = xoutT[:, :N].T
    return xout, Cout


# ---------------------------------------------------------------------------
# Pure numpy reference (mirrors the PyTorch forward exactly, f32 throughout)
# ---------------------------------------------------------------------------

def reference_forward(params, x, edge_index, C, nedgeinput, nnodeinput):
    p = {k: np.asarray(v, np.float32) for k, v in params.items()}
    x = np.asarray(x, np.float32)
    C = np.asarray(C, np.float32)
    ei0 = np.asarray(edge_index[0])
    ei1 = np.asarray(edge_index[1])
    N = x.shape[0]

    l1 = C @ p['W1'] / nedgeinput
    l2 = C @ p['W2'] / nedgeinput
    X3 = C @ p['W3'] / nedgeinput
    X4 = C @ p['W4'] / nedgeinput
    h5 = x @ p['W5'] / nnodeinput

    diag = np.zeros((h5.shape[1], N, N), np.float32)
    for f in range(h5.shape[1]):
        np.fill_diagonal(diag[f], h5[:, f])
    tmp_diag = diag[:, ei0, ei1].T

    A3 = np.zeros((nedgeinput, N, N), np.float32); A3[:, ei0, ei1] = X3.T
    A4 = np.zeros((nedgeinput, N, N), np.float32); A4[:, ei0, ei1] = X4.T
    res = np.matmul(A3, A4)
    tmp_matmul = res[:, ei0, ei1].T

    tmp = np.concatenate([C, l1 * l2, tmp_diag, tmp_matmul], axis=1)
    Cout = np.maximum(tmp @ p['Wm1'], 0.0) @ p['Wm2']

    K = Cout.shape[1]
    AC = np.zeros((K, N, N), np.float32); AC[:, ei0, ei1] = Cout.T
    agg = np.matmul(AC, x)                              # (K, N, n_in)
    agg = np.einsum('kni,kio->no', agg, p['Wagg']) + p['bagg']
    xout = agg / nnodeinput
    return xout, Cout


# ---------------------------------------------------------------------------

if __name__ == "__main__":
    def run_case(seed, N, nedgeinput, nedgeoutput, nnodeinput, nnodeoutput):
        key = jax.random.PRNGKey(seed)
        kx, kc, kp = jax.random.split(key, 3)

        # graph: self-loops + directed ring -> E = 2N, no duplicate (i, j)
        ar = jnp.arange(N, dtype=jnp.int32)
        src = jnp.concatenate([ar, ar])
        dst = jnp.concatenate([ar, (ar + 1) % N])
        edge_index = jnp.stack([src, dst])               # (2, E)
        E = edge_index.shape[1]

        x = jax.random.normal(kx, (N, nnodeinput), jnp.float32)
        C = jax.random.normal(kc, (E, nedgeinput), jnp.float32)
        batch_node = jnp.zeros((N,), jnp.float32)

        params = init_params(kp, nedgeinput, nedgeoutput, nnodeinput,
                             nnodeoutput)

        fwd = jax.jit(functools.partial(g2n2_forward,
                                        nedgeinput=nedgeinput,
                                        nnodeinput=nnodeinput))
        xout, Cout = fwd(params, x, edge_index, C, batch_node)
        jax.block_until_ready((xout, Cout))

        xref, Cref = reference_forward(params, x, edge_index, C,
                                       nedgeinput, nnodeinput)
        # bf16 is used for the dense A3/A4 operands -> relaxed tolerances.
        np.testing.assert_allclose(np.asarray(Cout), Cref, rtol=3e-2, atol=3e-2)
        np.testing.assert_allclose(np.asarray(xout), xref, rtol=3e-2, atol=3e-2)

    # lane-aligned case
    run_case(0, N=128, nedgeinput=4, nedgeoutput=6, nnodeinput=4,
             nnodeoutput=8)
    # irregular case exercising the N / E padding paths
    run_case(1, N=50, nedgeinput=4, nedgeoutput=6, nnodeinput=4,
             nnodeoutput=8)

    print("KERNEL_OK")
</pallas_src>

<mosaic_0001>
module attributes {stable_mosaic.version = 11 : i64} {
  func.func @_bmm_kernel(%arg0: i32, %arg1: i32, %arg2: i32, %arg3: i32, %arg4: memref<1x128x128xbf16, #tpu.memory_space<vmem>>, %arg5: memref<1x128x128xbf16, #tpu.memory_space<vmem>>, %arg6: memref<1x128x128xf32, #tpu.memory_space<vmem>>, %arg7: memref<128x128xf32, #tpu.memory_space<vmem>>) attributes {dimension_semantics = [#tpu.dimension_semantics<parallel>, #tpu.dimension_semantics<parallel>, #tpu.dimension_semantics<parallel>, #tpu.dimension_semantics<arbitrary>], iteration_bounds = array<i64: 4, 1, 1, 1>, scalar_prefetch = 0 : i64, scratch_operands = 1 : i64, tpu.core_type = #tpu.core_type<tc>, window_params = [{transform_indices = @transform_0, window_bounds = array<i64: 1, 128, 128>}, {transform_indices = @transform_1, window_bounds = array<i64: 1, 128, 128>}, {transform_indices = @transform_2, window_bounds = array<i64: 1, 128, 128>}]} {
    %c0_i32 = arith.constant 0 : i32
    %0 = arith.cmpi eq, %arg3, %c0_i32 : i32
    %1 = arith.extui %0 : i1 to i32
    %c0_i32_0 = arith.constant 0 : i32
    %2 = arith.cmpi ne, %1, %c0_i32_0 : i32
    scf.if %2 {
      %cst_12 = arith.constant 0.000000e+00 : f32
      %14 = vector.broadcast %cst_12 : f32 to vector<128x128xf32>
      %c0_13 = arith.constant 0 : index
      %c0_14 = arith.constant 0 : index
      %15 = vector.load %arg7[%c0_13, %c0_14] : memref<128x128xf32, #tpu.memory_space<vmem>>, vector<128x128xf32>
      tpu.vector_store %arg7[%c0_13, %c0_14], %14 {strides = array<i32>} : memref<128x128xf32, #tpu.memory_space<vmem>>, vector<128x128xf32>,
    } else {
    }
    %c0 = arith.constant 0 : index
    %c0_1 = arith.constant 0 : index
    %3 = vector.load %arg7[%c0, %c0_1] : memref<128x128xf32, #tpu.memory_space<vmem>>, vector<128x128xf32>
    %c0_2 = arith.constant 0 : index
    %c0_3 = arith.constant 0 : index
    %c0_4 = arith.constant 0 : index
    %4 = vector.load %arg4[%c0_2, %c0_3, %c0_4] : memref<1x128x128xbf16, #tpu.memory_space<vmem>>, vector<1x128x128xbf16>
    %5 = vector.shape_cast %4 : vector<1x128x128xbf16> to vector<128x128xbf16>
    %c0_5 = arith.constant 0 : index
    %c0_6 = arith.constant 0 : index
    %c0_7 = arith.constant 0 : index
    %6 = vector.load %arg5[%c0_5, %c0_6, %c0_7] : memref<1x128x128xbf16, #tpu.memory_space<vmem>>, vector<1x128x128xbf16>
    %7 = vector.shape_cast %6 : vector<1x128x128xbf16> to vector<128x128xbf16>
    %cst = arith.constant dense<0.000000e+00> : vector<128x128xf32>
    %8 = tpu.matmul %5, %7, %cst {dimension_numbers = #tpu.dot_dimension_numbers<[1], [0], [0], [1], [0, 0, 1, 1], [], []>} : vector<128x128xbf16>, vector<128x128xbf16>, vector<128x128xf32> -> vector<128x128xf32>
    %9 = arith.addf %3, %8 : vector<128x128xf32>
    %c0_8 = arith.constant 0 : index
    %c0_9 = arith.constant 0 : index
    %10 = vector.load %arg7[%c0_8, %c0_9] : memref<128x128xf32, #tpu.memory_space<vmem>>, vector<128x128xf32>
    tpu.vector_store %arg7[%c0_8, %c0_9], %9 {strides = array<i32>} : memref<128x128xf32, #tpu.memory_space<vmem>>, vector<128x128xf32>,
    %c0_i32_10 = arith.constant 0 : i32
    %11 = arith.cmpi eq, %arg3, %c0_i32_10 : i32
    %12 = arith.extui %11 : i1 to i32
    %c0_i32_11 = arith.constant 0 : i32
    %13 = arith.cmpi ne, %12, %c0_i32_11 : i32
    scf.if %13 {
      %c0_12 = arith.constant 0 : index
      %c0_13 = arith.constant 0 : index
      %14 = vector.load %arg7[%c0_12, %c0_13] : memref<128x128xf32, #tpu.memory_space<vmem>>, vector<128x128xf32>
      %c0_14 = arith.constant 0 : index
      %c0_15 = arith.constant 0 : index
      %c0_16 = arith.constant 0 : index
      %15 = vector.load %arg6[%c0_14, %c0_15, %c0_16] : memref<1x128x128xf32, #tpu.memory_space<vmem>>, vector<1x128x128xf32>
      %16 = vector.shape_cast %15 : vector<1x128x128xf32> to vector<128x128xf32>
      %17 = vector.shape_cast %14 : vector<128x128xf32> to vector<1x128x128xf32>
      tpu.vector_store %arg6[%c0_14, %c0_15, %c0_16], %17 {strides = array<i32>} : memref<1x128x128xf32, #tpu.memory_space<vmem>>, vector<1x128x128xf32>,
    } else {
    }
    return
  }
  func.func @transform_0(%arg0: i32, %arg1: i32, %arg2: i32, %arg3: i32) -> (i32, i32, i32) {
    %c0_i32 = arith.constant 0 : i32
    return %arg0, %arg1, %arg3 : i32, i32, i32
  }
  func.func @transform_1(%arg0: i32, %arg1: i32, %arg2: i32, %arg3: i32) -> (i32, i32, i32) {
    %c0_i32 = arith.constant 0 : i32
    return %arg0, %arg3, %arg2 : i32, i32, i32
  }
  func.func @transform_2(%arg0: i32, %arg1: i32, %arg2: i32, %arg3: i32) -> (i32, i32, i32) {
    %c0_i32 = arith.constant 0 : i32
    return %arg0, %arg1, %arg2 : i32, i32, i32
  }
}

module attributes {stable_mosaic.version = 11 : i64} {
  func.func @_edge_mlp_kernel(%arg0: i32, %arg1: memref<128x4xf32, #tpu.memory_space<vmem>>, %arg2: memref<128x4xf32, #tpu.memory_space<vmem>>, %arg3: memref<128x4xf32, #tpu.memory_space<vmem>>, %arg4: memref<4x8xf32, #tpu.memory_space<vmem>>, %arg5: memref<16x32xf32, #tpu.memory_space<vmem>>, %arg6: memref<32x6xf32, #tpu.memory_space<vmem>>, %arg7: memref<128x6xf32, #tpu.memory_space<vmem>>) attributes {dimension_semantics = [#tpu.dimension_semantics<parallel>], iteration_bounds = array<i64: 2>, scalar_prefetch = 0 : i64, scratch_operands = 0 : i64, tpu.core_type = #tpu.core_type<tc>, window_params = [{transform_indices = @transform_0, window_bounds = array<i64: 128, 4>}, {transform_indices = @transform_1, window_bounds = array<i64: 128, 4>}, {transform_indices = @transform_2, window_bounds = array<i64: 128, 4>}, {pipeline_mode = #tpu.pipeline_mode<synchronous>, transform_indices = @transform_3, window_bounds = array<i64: 4, 8>}, {pipeline_mode = #tpu.pipeline_mode<synchronous>, transform_indices = @transform_4, window_bounds = array<i64: 16, 32>}, {pipeline_mode = #tpu.pipeline_mode<synchronous>, transform_indices = @transform_5, window_bounds = array<i64: 32, 6>}, {transform_indices = @transform_6, window_bounds = array<i64: 128, 6>}]} {
    %c0 = arith.constant 0 : index
    %c0_0 = arith.constant 0 : index
    %0 = vector.load %arg1[%c0, %c0_0] : memref<128x4xf32, #tpu.memory_space<vmem>>, vector<128x4xf32>
    %c0_1 = arith.constant 0 : index
    %c0_2 = arith.constant 0 : index
    %1 = vector.load %arg4[%c0_1, %c0_2] : memref<4x8xf32, #tpu.memory_space<vmem>>, vector<4x8xf32>
    %cst = arith.constant dense<0.000000e+00> : vector<128x8xf32>
    %2 = tpu.matmul %0, %1, %cst {dimension_numbers = #tpu.dot_dimension_numbers<[1], [0], [0], [1], [0, 0, 1, 1], [], []>} : vector<128x4xf32>, vector<4x8xf32>, vector<128x8xf32> -> vector<128x8xf32>
    %cst_3 = arith.constant 2.500000e-01 : f32
    %3 = vector.broadcast %cst_3 : f32 to vector<128x8xf32>
    %4 = arith.mulf %2, %3 : vector<128x8xf32>
    %5 = vector.extract_strided_slice %4 {offsets = [0, 0], sizes = [128, 4], strides = [1, 1]} : vector<128x8xf32> to vector<128x4xf32>
    %6 = vector.extract_strided_slice %4 {offsets = [0, 4], sizes = [128, 4], strides = [1, 1]} : vector<128x8xf32> to vector<128x4xf32>
    %7 = arith.mulf %5, %6 : vector<128x4xf32>
    %c0_4 = arith.constant 0 : index
    %c0_5 = arith.constant 0 : index
    %8 = vector.load %arg2[%c0_4, %c0_5] : memref<128x4xf32, #tpu.memory_space<vmem>>, vector<128x4xf32>
    %c0_6 = arith.constant 0 : index
    %c0_7 = arith.constant 0 : index
    %9 = vector.load %arg3[%c0_6, %c0_7] : memref<128x4xf32, #tpu.memory_space<vmem>>, vector<128x4xf32>
    %10 = tpu.concatenate %0, %7, %8, %9 in 1 : vector<128x4xf32>, vector<128x4xf32>, vector<128x4xf32>, vector<128x4xf32> -> vector<128x16xf32>
    %c0_8 = arith.constant 0 : index
    %c0_9 = arith.constant 0 : index
    %11 = vector.load %arg5[%c0_8, %c0_9] : memref<16x32xf32, #tpu.memory_space<vmem>>, vector<16x32xf32>
    %cst_10 = arith.constant dense<0.000000e+00> : vector<128x32xf32>
    %12 = tpu.matmul %10, %11, %cst_10 {dimension_numbers = #tpu.dot_dimension_numbers<[1], [0], [0], [1], [0, 0, 1, 1], [], []>} : vector<128x16xf32>, vector<16x32xf32>, vector<128x32xf32> -> vector<128x32xf32>
    %cst_11 = arith.constant 0.000000e+00 : f32
    %13 = vector.broadcast %cst_11 : f32 to vector<128x32xf32>
    %14 = arith.maximumf %12, %13 : vector<128x32xf32>
    %c0_12 = arith.constant 0 : index
    %c0_13 = arith.constant 0 : index
    %15 = vector.load %arg6[%c0_12, %c0_13] : memref<32x6xf32, #tpu.memory_space<vmem>>, vector<32x6xf32>
    %cst_14 = arith.constant dense<0.000000e+00> : vector<128x6xf32>
    %16 = tpu.matmul %14, %15, %cst_14 {dimension_numbers = #tpu.dot_dimension_numbers<[1], [0], [0], [1], [0, 0, 1, 1], [], []>} : vector<128x32xf32>, vector<32x6xf32>, vector<128x6xf32> -> vector<128x6xf32>
    %c0_15 = arith.constant 0 : index
    %c0_16 = arith.constant 0 : index
    %17 = vector.load %arg7[%c0_15, %c0_16] : memref<128x6xf32, #tpu.memory_space<vmem>>, vector<128x6xf32>
    tpu.vector_store %arg7[%c0_15, %c0_16], %16 {strides = array<i32>} : memref<128x6xf32, #tpu.memory_space<vmem>>, vector<128x6xf32>,
    return
  }
  func.func @transform_0(%arg0: i32) -> (i32, i32) {
    %c0_i32 = arith.constant 0 : i32
    %c0_i32_0 = arith.constant 0 : i32
    return %arg0, %c0_i32 : i32, i32
  }
  func.func @transform_1(%arg0: i32) -> (i32, i32) {
    %c0_i32 = arith.constant 0 : i32
    %c0_i32_0 = arith.constant 0 : i32
    return %arg0, %c0_i32 : i32, i32
  }
  func.func @transform_2(%arg0: i32) -> (i32, i32) {
    %c0_i32 = arith.constant 0 : i32
    %c0_i32_0 = arith.constant 0 : i32
    return %arg0, %c0_i32 : i32, i32
  }
  func.func @transform_3(%arg0: i32) -> (i32, i32) {
    %c0_i32 = arith.constant 0 : i32
    %c0_i32_0 = arith.constant 0 : i32
    %c0_i32_1 = arith.constant 0 : i32
    return %c0_i32, %c0_i32_0 : i32, i32
  }
  func.func @transform_4(%arg0: i32) -> (i32, i32) {
    %c0_i32 = arith.constant 0 : i32
    %c0_i32_0 = arith.constant 0 : i32
    %c0_i32_1 = arith.constant 0 : i32
    return %c0_i32, %c0_i32_0 : i32, i32
  }
  func.func @transform_5(%arg0: i32) -> (i32, i32) {
    %c0_i32 = arith.constant 0 : i32
    %c0_i32_0 = arith.constant 0 : i32
    %c0_i32_1 = arith.constant 0 : i32
    return %c0_i32, %c0_i32_0 : i32, i32
  }
  func.func @transform_6(%arg0: i32) -> (i32, i32) {
    %c0_i32 = arith.constant 0 : i32
    %c0_i32_0 = arith.constant 0 : i32
    return %arg0, %c0_i32 : i32, i32
  }
}

module attributes {stable_mosaic.version = 11 : i64} {
  func.func @_agg_kernel(%arg0: i32, %arg1: i32, %arg2: memref<8x384xf32, #tpu.memory_space<vmem>>, %arg3: memref<384x128xf32, #tpu.memory_space<vmem>>, %arg4: memref<8x1xf32, #tpu.memory_space<vmem>>, %arg5: memref<8x128xf32, #tpu.memory_space<vmem>>, %arg6: memref<8x128xf32, #tpu.memory_space<vmem>>) attributes {dimension_semantics = [#tpu.dimension_semantics<parallel>, #tpu.dimension_semantics<arbitrary>], iteration_bounds = array<i64: 1, 2>, scalar_prefetch = 0 : i64, scratch_operands = 1 : i64, tpu.core_type = #tpu.core_type<tc>, window_params = [{transform_indices = @transform_0, window_bounds = array<i64: 8, 384>}, {transform_indices = @transform_1, window_bounds = array<i64: 384, 128>}, {pipeline_mode = #tpu.pipeline_mode<synchronous>, transform_indices = @transform_2, window_bounds = array<i64: 8, 1>}, {transform_indices = @transform_3, window_bounds = array<i64: 8, 128>}]} {
    %c0_i32 = arith.constant 0 : i32
    %0 = arith.cmpi eq, %arg1, %c0_i32 : i32
    %1 = arith.extui %0 : i1 to i32
    %c0_i32_0 = arith.constant 0 : i32
    %2 = arith.cmpi ne, %1, %c0_i32_0 : i32
    scf.if %2 {
      %cst_9 = arith.constant 0.000000e+00 : f32
      %12 = vector.broadcast %cst_9 : f32 to vector<8x128xf32>
      %c0_10 = arith.constant 0 : index
      %c0_11 = arith.constant 0 : index
      %13 = vector.load %arg6[%c0_10, %c0_11] : memref<8x128xf32, #tpu.memory_space<vmem>>, vector<8x128xf32>
      tpu.vector_store %arg6[%c0_10, %c0_11], %12 {strides = array<i32>} : memref<8x128xf32, #tpu.memory_space<vmem>>, vector<8x128xf32>,
    } else {
    }
    %c0 = arith.constant 0 : index
    %c0_1 = arith.constant 0 : index
    %3 = vector.load %arg6[%c0, %c0_1] : memref<8x128xf32, #tpu.memory_space<vmem>>, vector<8x128xf32>
    %c0_2 = arith.constant 0 : index
    %c0_3 = arith.constant 0 : index
    %4 = vector.load %arg2[%c0_2, %c0_3] : memref<8x384xf32, #tpu.memory_space<vmem>>, vector<8x384xf32>
    %c0_4 = arith.constant 0 : index
    %c0_5 = arith.constant 0 : index
    %5 = vector.load %arg3[%c0_4, %c0_5] : memref<384x128xf32, #tpu.memory_space<vmem>>, vector<384x128xf32>
    %cst = arith.constant dense<0.000000e+00> : vector<8x128xf32>
    %6 = tpu.matmul %4, %5, %cst {dimension_numbers = #tpu.dot_dimension_numbers<[1], [0], [0], [1], [0, 0, 1, 1], [], []>} : vector<8x384xf32>, vector<384x128xf32>, vector<8x128xf32> -> vector<8x128xf32>
    %7 = arith.addf %3, %6 : vector<8x128xf32>
    %c0_6 = arith.constant 0 : index
    %c0_7 = arith.constant 0 : index
    %8 = vector.load %arg6[%c0_6, %c0_7] : memref<8x128xf32, #tpu.memory_space<vmem>>, vector<8x128xf32>
    tpu.vector_store %arg6[%c0_6, %c0_7], %7 {strides = array<i32>} : memref<8x128xf32, #tpu.memory_space<vmem>>, vector<8x128xf32>,
    %c1_i32 = arith.constant 1 : i32
    %9 = arith.cmpi eq, %arg1, %c1_i32 : i32
    %10 = arith.extui %9 : i1 to i32
    %c0_i32_8 = arith.constant 0 : i32
    %11 = arith.cmpi ne, %10, %c0_i32_8 : i32
    scf.if %11 {
      %c0_9 = arith.constant 0 : index
      %c0_10 = arith.constant 0 : index
      %12 = vector.load %arg6[%c0_9, %c0_10] : memref<8x128xf32, #tpu.memory_space<vmem>>, vector<8x128xf32>
      %c0_11 = arith.constant 0 : index
      %c0_12 = arith.constant 0 : index
      %13 = vector.load %arg4[%c0_11, %c0_12] : memref<8x1xf32, #tpu.memory_space<vmem>>, vector<8x1xf32>
      %14 = vector.broadcast %13 : vector<8x1xf32> to vector<8x128xf32>
      %15 = arith.addf %12, %14 : vector<8x128xf32>
      %cst_13 = arith.constant 2.500000e-01 : f32
      %16 = vector.broadcast %cst_13 : f32 to vector<8x128xf32>
      %17 = arith.mulf %15, %16 : vector<8x128xf32>
      %c0_14 = arith.constant 0 : index
      %c0_15 = arith.constant 0 : index
      %18 = vector.load %arg5[%c0_14, %c0_15] : memref<8x128xf32, #tpu.memory_space<vmem>>, vector<8x128xf32>
      tpu.vector_store %arg5[%c0_14, %c0_15], %17 {strides = array<i32>} : memref<8x128xf32, #tpu.memory_space<vmem>>, vector<8x128xf32>,
    } else {
    }
    return
  }
  func.func @transform_0(%arg0: i32, %arg1: i32) -> (i32, i32) {
    %c0_i32 = arith.constant 0 : i32
    %c0_i32_0 = arith.constant 0 : i32
    return %c0_i32, %arg1 : i32, i32
  }
  func.func @transform_1(%arg0: i32, %arg1: i32) -> (i32, i32) {
    %c0_i32 = arith.constant 0 : i32
    return %arg1, %arg0 : i32, i32
  }
  func.func @transform_2(%arg0: i32, %arg1: i32) -> (i32, i32) {
    %c0_i32 = arith.constant 0 : i32
    %c0_i32_0 = arith.constant 0 : i32
    %c0_i32_1 = arith.constant 0 : i32
    return %c0_i32, %c0_i32_0 : i32, i32
  }
  func.func @transform_3(%arg0: i32, %arg1: i32) -> (i32, i32) {
    %c0_i32 = arith.constant 0 : i32
    %c0_i32_0 = arith.constant 0 : i32
    return %c0_i32, %arg0 : i32, i32
  }
}

</mosaic_0001>

<bundles_post_ra>
// kernel: g2n2_forward.3
= control target key start
LH: loop header
LB: loop body
LE: loop exit
PB: predicated region body
PF: predicated region fallthrough
CT: control target
= control target key end

     0   :  { %s894_s9 = smov 0   ;;  %s896_s10 = smov 0   ;;  %s972_s0 = inlined_call_operand.vmem [shape: bf16[4,128,128], index: 0, kind: input, shape index: {}]   ;;  %s973_s1 = inlined_call_operand.vmem [shape: bf16[4,128,128], index: 1, kind: input, shape index: {}]   ;;  %s974_s2 = inlined_call_operand.vmem [shape: f32[4,128,128], index: 2, kind: output, shape index: {}]  }
   0x1   :  { %s898_s11 = smov 0  }
   0x2 LB: > { %s38_s12 = sadd.s32 1, %s873_s10  ;;  %p723_p0 = scmp.ge.s32.totalorder %s877_s11, 1  ;;  %s877_s11 = sphi %s898_s11, %s12_s11   ;;  %s873_s10 = sphi %s896_s10, %s976_s10   ;;  %s869_s9 = sphi %s894_s9, %s975_s9  }
   0x3   : > { %p40_p1 = scmp.ge.s32.totalorder %s38_s12, 4  ;;  %p176_p2 = scmp.lt.s32.totalorder %s877_s11, 5 }
   0x5   : > { %s978_s12 = smov (%p40_p1, %s38_s12), 0  ;;  %p177_p3 = pnand %p723_p0, %p176_p2 }
   0x6   : > { %p225_p4 = scmp.lt.s32.totalorder (!%p177_p3), %s869_s9, 3 }
   0x7   : > { %180 = sbr.rel (%p177_p3) target bundleno = 256 (0x100), region = 28 }
   0xc   : > { %s980_s9 = smov (!%p225_p4, %s869_s9), 3 }
   0xd   : > { %s748_s13 = sshll.u32 %s980_s9, 6  ;;  %s750_s20 = sshll.u32 %s980_s9, 7 }
   0xe   : > { %s918_s16 = scalar_lea.vmem %s973_s1, %s748_s13  ;;  %s926_s19 = scalar_lea.vmem %s972_s0, %s748_s13 }
   0xf   : > { %v839_v0 = vld [vmem:[%s918_s16 + $0x38] sm:$0xff]   ;;  %v840_v1 = vld [vmem:[%s918_s16 + $0x30] sm:$0xff]   ;;  %v841_v2 = vld [vmem:[%s918_s16 + $0x28] sm:$0xff]   ;;  %s945_s23 = scalar_lea.vmem %s974_s2, %s750_s20 }
  0x10   : > { %767 = vmatprep.subr.bf16.mxu0 %v839_v0  ;;  %799 = vmatprep.subr.bf16.mxu1 %v839_v0  ;;  %v842_v3 = vld [vmem:[%s918_s16 + $0x20] sm:$0xff]   ;;  %v843_v6 = vld [vmem:[%s918_s16 + $0x18] sm:$0xff]   ;;  %v844_v7 = vld [vmem:[%s918_s16 + $0x10] sm:$0xff]  }
  0x11   : > { %768 = vmatpush3.bf16.msra.mxu0 %v839_v0  ;;  %807 = vmatpush3.bf16.msra.mxu1 %v839_v0  ;;  %v847_v4 = vld [vmem:[%s926_s19] sm:$0xff]   ;;  %v845_v8 = vld [vmem:[%s918_s16 + $0x8] sm:$0xff]   ;;  %v851_v12 = vld [vmem:[%s926_s19 + $0x10] sm:$0xff]  }
  0x12   : > { %769 = vmatprep.subr.bf16.mxu0 %v840_v1  ;;  %800 = vmatprep.subr.bf16.mxu1 %v840_v1  ;;  %v848_v5 = vld [vmem:[%s926_s19 + $0x20] sm:$0xff]   ;;  %v849_v10 = vld [vmem:[%s926_s19 + $0x8] sm:$0xff]   ;;  %v852_v13 = vld [vmem:[%s926_s19 + $0x30] sm:$0xff]  }
  0x13   : > { %783 = vmatprep.mubr.bf16.mxu0 %v847_v4  ;;  %791 = vmatprep.mubr.bf16.mxu1 %v848_v5  ;;  %v846_v9 = vld [vmem:[%s918_s16] sm:$0xff]   ;;  %v850_v11 = vld [vmem:[%s926_s19 + $0x28] sm:$0xff]   ;;  %v853_v14 = vld [vmem:[%s926_s19 + $0x18] sm:$0xff]  }
  0x14   : > { %v854_v15 = vld [vmem:[%s926_s19 + $0x38] sm:$0xff]  }
  0x15   : > { %770 = vmatpush3.bf16.msra.mxu0 %v840_v1  ;;  %808 = vmatpush3.bf16.msra.mxu1 %v840_v1 }
  0x16   : > { %771 = vmatprep.subr.bf16.mxu0 %v841_v2  ;;  %801 = vmatprep.subr.bf16.mxu1 %v841_v2 }
  0x19   : > { %772 = vmatpush3.bf16.msra.mxu0 %v841_v2  ;;  %809 = vmatpush3.bf16.msra.mxu1 %v841_v2 }
  0x1a   : > { %773 = vmatprep.subr.bf16.mxu0 %v842_v3  ;;  %802 = vmatprep.subr.bf16.mxu1 %v842_v3 }
  0x1d   : > { %774 = vmatpush3.bf16.msra.mxu0 %v842_v3  ;;  %810 = vmatpush3.bf16.msra.mxu1 %v842_v3 }
  0x1e   : > { %775 = vmatprep.subr.bf16.mxu0 %v843_v6  ;;  %803 = vmatprep.subr.bf16.mxu1 %v843_v6 }
  0x21   : > { %776 = vmatpush3.bf16.msra.mxu0 %v843_v6  ;;  %811 = vmatpush3.bf16.msra.mxu1 %v843_v6 }
  0x22   : > { %777 = vmatprep.subr.bf16.mxu0 %v844_v7  ;;  %804 = vmatprep.subr.bf16.mxu1 %v844_v7 }
  0x25   : > { %778 = vmatpush3.bf16.msra.mxu0 %v844_v7  ;;  %812 = vmatpush3.bf16.msra.mxu1 %v844_v7 }
  0x26   : > { %779 = vmatprep.subr.bf16.mxu0 %v845_v8  ;;  %805 = vmatprep.subr.bf16.mxu1 %v845_v8 }
  0x29   : > { %780 = vmatpush3.bf16.msra.mxu0 %v845_v8  ;;  %813 = vmatpush3.bf16.msra.mxu1 %v845_v8 }
  0x2a   : > { %781 = vmatprep.subr.bf16.mxu0 %v846_v9  ;;  %806 = vmatprep.subr.bf16.mxu1 %v846_v9 }
  0x2d   : > { %782 = vmatpush3.bf16.msra.mxu0 %v846_v9  ;;  %814 = vmatpush3.bf16.msra.mxu1 %v846_v9 }
  0x30   : > { %784 = vmatmul.mubr.bf16.vlgmr.msra.gmra.mxu0 %v849_v10  ;;  %792 = vmatmul.mubr.bf16.vlgmr.msra.gmra.mxu1 %v850_v11 }
  0x31   : > { %787 = vmatprep.mubr.bf16.mxu0 %v851_v12  ;;  %795 = vmatprep.mubr.bf16.mxu1 %v852_v13 }
  0x38   : > { %788 = vmatmul.mubr.bf16.gmra.mxu0 %v853_v14  ;;  %796 = vmatmul.mubr.bf16.gmra.mxu1 %v854_v15 }
  0xf0   : > { %v785_v16 = vpop.f32.mrf.mxu0  ;;  %v793_v17 = vpop.f32.mrf.mxu1 }
  0xf1   : > { %578 = vst [vmem:[%s945_s23 + $0x10] sm:$0xff] %v785_v16  ;;  %586 = vst [vmem:[%s945_s23 + $0x50] sm:$0xff] %v793_v17 }
  0xf2   : > { %v462_v18 = vpop.f32.mrf.mxu0  ;;  %v494_v19 = vpop.f32.mrf.mxu1 }
  0xf3   : > { %576 = vst [vmem:[%s945_s23] sm:$0xff] %v462_v18  ;;  %584 = vst [vmem:[%s945_s23 + $0x40] sm:$0xff] %v494_v19 }
  0xf4   : > { %v786_v20 = vpop.f32.mrf.mxu0  ;;  %v794_v21 = vpop.f32.mrf.mxu1 }
  0xf5   : > { %579 = vst [vmem:[%s945_s23 + $0x18] sm:$0xff] %v786_v20  ;;  %587 = vst [vmem:[%s945_s23 + $0x58] sm:$0xff] %v794_v21 }
  0xf6   : > { %v465_v22 = vpop.f32.mrf.mxu0  ;;  %v497_v23 = vpop.f32.mrf.mxu1 }
  0xf7   : > { %577 = vst [vmem:[%s945_s23 + $0x8] sm:$0xff] %v465_v22  ;;  %585 = vst [vmem:[%s945_s23 + $0x48] sm:$0xff] %v497_v23 }
  0xf8   : > { %v789_v24 = vpop.f32.mrf.mxu0  ;;  %v797_v25 = vpop.f32.mrf.mxu1 }
  0xf9   : > { %582 = vst [vmem:[%s945_s23 + $0x30] sm:$0xff] %v789_v24  ;;  %590 = vst [vmem:[%s945_s23 + $0x70] sm:$0xff] %v797_v25 }
  0xfa   : > { %v478_v26 = vpop.f32.mrf.mxu0  ;;  %v510_v27 = vpop.f32.mrf.mxu1 }
  0xfb   : > { %580 = vst [vmem:[%s945_s23 + $0x20] sm:$0xff] %v478_v26  ;;  %588 = vst [vmem:[%s945_s23 + $0x60] sm:$0xff] %v510_v27 }
  0xfc   : > { %v790_v28 = vpop.f32.mrf.mxu0  ;;  %v798_v29 = vpop.f32.mrf.mxu1 }
  0xfd   : > { %583 = vst [vmem:[%s945_s23 + $0x38] sm:$0xff] %v790_v28  ;;  %591 = vst [vmem:[%s945_s23 + $0x78] sm:$0xff] %v798_v29 }
  0xfe   : > { %v481_v30 = vpop.f32.mrf.mxu0  ;;  %v513_v31 = vpop.f32.mrf.mxu1 }
  0xff   : > { %581 = vst [vmem:[%s945_s23 + $0x28] sm:$0xff] %v481_v30  ;;  %589 = vst [vmem:[%s945_s23 + $0x68] sm:$0xff] %v513_v31 }
 0x100 PF: > { %s12_s11 = sadd.s32 1, %s877_s11   ;;  %s975_s9 = smov %s873_s10 }
 0x101   : > { %p9_p5 = scmp.ge.s32.totalorder %s12_s11, 6   ;;  %s976_s10 = smov %s978_s12 }
 0x103   :  { %11 = sbr.rel (!%p9_p5) target bundleno = 2 (0x2), region = 69 }

// kernel: g2n2_forward.4
= control target key start
LH: loop header
LB: loop body
LE: loop exit
PB: predicated region body
PF: predicated region fallthrough
CT: control target
= control target key end

     0   :  { %s1657_s21 = smov 0   ;;  %s2146_s0 = inlined_call_operand.vmem [shape: f32[256,4], index: 0, kind: input, shape index: {}]   ;;  %s2147_s1 = inlined_call_operand.vmem [shape: f32[256,4], index: 1, kind: input, shape index: {}]   ;;  %s2148_s2 = inlined_call_operand.vmem [shape: f32[256,4], index: 2, kind: input, shape index: {}]   ;;  %s2149_s3 = inlined_call_operand.vmem [shape: f32[4,8], index: 3, kind: input, shape index: {}]   ;;  %s2150_s4 = inlined_call_operand.vmem [shape: f32[16,32], index: 4, kind: input, shape index: {}]   ;;  %s2151_s5 = inlined_call_operand.vmem [shape: f32[32,6], index: 5, kind: input, shape index: {}]   ;;  %s2152_s6 = inlined_call_operand.vmem [shape: f32[256,6], index: 6, kind: output, shape index: {}]  }
   0x1 LB: > { %s1391_s22 = sadd.s32 4294967295, %s1616_s21   ;;  %p1395_p0 = scmp.ge.s32.totalorder %s1616_s21, 1  ;;  %s1616_s21 = sphi %s1657_s21, %s16_s21  }
   0x2   : > { %p235_p1 = scmp.lt.s32.totalorder %s1616_s21, 3 }
   0x4   : > { %p236_p2 = pnand %p1395_p0, %p235_p1 }
   0x5   : > { %s1396_s25 = sshll.u32 (!%p236_p2), %s1391_s22, 4  ;;  %s1618_s12 = smov (!%p236_p2), 8  }
   0x6   : > { %239 = sbr.rel (%p236_p2) target bundleno = 888 (0x378), region = 44  ;;  %p276_p3 = scmp.lt.s32.totalorder (!%p236_p2), %s1396_s25, 31 }
   0x7   : > { %s1619_s13 = smov (!%p236_p2), 12   ;;  %s1620_s14 = smov (!%p236_p2), 124  }
   0x8   : > { %s1621_s19 = smov (!%p236_p2), 4  }
   0xb   : > { %v315_v0 = vld [vmem:[%s2149_s3] sm:$0xf]  ;;  %vm365_vm0 = vcmask 1043456   ;;  %s2154_s25 = smov (!%p276_p3, %s1396_s25), 31  ;;  %vm316_vm1 = vcmask 31744   ;;  %vm850_vm2 = vcmask 64512  }
   0xc   : > { %1510 = vmatprep.subr.msk.mxu0 %vm365_vm0, %v315_v0  ;;  %1596 = vmatprep.subr.msk.mxu1 %vm365_vm0, %v315_v0  ;;  %s1668_s26 = sshll.u32 %s2154_s25, 3  ;;  %vm867_vm3 = vcmask 97280   ;;  %vm886_vm4 = vcmask 130048   ;;  %vm1100_vm5 = vcmask 261120   ;;  %vm1294_vm6 = vcmask 48128  }
   0xd   : > { %1511 = vmatpush3.msk.msra.mxu0 %vm365_vm0, %v315_v0  ;;  %1597 = vmatpush3.msk.msra.mxu1 %vm365_vm0, %v315_v0  ;;  %s1674_s29 = scalar_lea.vmem %s2146_s0, %s1668_s26  ;;  %s1706_s8 = scalar_lea.vmem %s2147_s1, %s1668_s26 }
   0xe   : > { %v1677_v1 = vld [vmem:[%s1674_s29] sm:$0xff]  ;;  %v1683_v3 = vld [vmem:[%s1674_s29 + $0x8] sm:$0xff]  ;;  %v1693_v5 = vld [vmem:[%s1674_s29 + $0x10] sm:$0xff]  ;;  %s1734_s11 = scalar_lea.vmem %s2148_s2, %s1668_s26 }
   0xf   : > { %v1680_v2 = vld [vmem:[%s1674_s29 + $0x40] sm:$0xff]  ;;  %1512 = vmatprep.mubr.msk.f32.mxu0 %vm316_vm1, %v1677_v1  ;;  %v1690_v4 = vld [vmem:[%s1674_s29 + $0x48] sm:$0xff]  ;;  %v1700_v6 = vld [vmem:[%s1674_s29 + $0x50] sm:$0xff] }
  0x10   : > { %1524 = vmatprep.mubr.msk.f32.mxu1 %vm316_vm1, %v1680_v2  ;;  %1513 = vmatmul.mubr.msk.f32.vlgmr.msra.gmra.mxu0 %vm316_vm1, %v1683_v3  ;;  %v1711_v7 = vld [vmem:[%s1674_s29 + $0x18] sm:$0xff]  ;;  %v1719_v9 = vld [vmem:[%s1674_s29 + $0x20] sm:$0xff]  ;;  %v611_v11 = vld [vmem:[%s1706_s8 + $0x8] sm:$0xff] }
  0x11   : > { %1525 = vmatmul.mubr.msk.f32.vlgmr.msra.gmra.mxu1 %vm316_vm1, %v1690_v4  ;;  %1515 = vmatprep.mubr.msk.f32.mxu0 %vm316_vm1, %v1693_v5  ;;  %v1716_v8 = vld [vmem:[%s1674_s29 + $0x58] sm:$0xff]  ;;  %v1722_v10 = vld [vmem:[%s1674_s29 + $0x60] sm:$0xff]  ;;  %v1739_v13 = vld [vmem:[%s1674_s29 + $0x28] sm:$0xff] }
  0x12   : > { %1527 = vmatprep.mubr.msk.f32.mxu1 %vm316_vm1, %v1700_v6  ;;  %v610_v12 = vld [vmem:[%s1706_s8] sm:$0xff]  ;;  %v1744_v14 = vld [vmem:[%s1674_s29 + $0x68] sm:$0xff]  ;;  %v1747_v15 = vld [vmem:[%s1674_s29 + $0x30] sm:$0xff]  ;;  %724 = vrot.lane.b32.xlu1 %v611_v11, %s1618_s12 }
  0x13   : > { %v1750_v16 = vld [vmem:[%s1674_s29 + $0x70] sm:$0xff]  ;;  %722 = vrot.lane.b32.xlu0 %v610_v12, %s1618_s12  ;;  %v627_v17 = vld [vmem:[%s1734_s11 + $0x8] sm:$0xff]  ;;  %v626_v18 = vld [vmem:[%s1734_s11] sm:$0xff] }
  0x14   : > { %1516 = vmatmul.mubr.msk.f32.gmra.mxu0 %vm316_vm1, %v1711_v7  ;;  %v1763_v19 = vld [vmem:[%s1674_s29 + $0x38] sm:$0xff]  ;;  %v612_v22 = vld [vmem:[%s1706_s8 + $0x10] sm:$0xff]  ;;  %v615_v25 = vld [vmem:[%s1706_s8 + $0x28] sm:$0xff] }
  0x15   : > { %1528 = vmatmul.mubr.msk.f32.gmra.mxu1 %vm316_vm1, %v1716_v8  ;;  %1518 = vmatprep.mubr.msk.f32.mxu0 %vm316_vm1, %v1719_v9  ;;  %v1768_v20 = vld [vmem:[%s1674_s29 + $0x78] sm:$0xff]  ;;  %v628_v24 = vld [vmem:[%s1734_s11 + $0x10] sm:$0xff]  ;;  %v614_v26 = vld [vmem:[%s1706_s8 + $0x20] sm:$0xff] }
  0x16   : > { %1530 = vmatprep.mubr.msk.f32.mxu1 %vm316_vm1, %v1722_v10  ;;  %788 = vrot.lane.b32.xlu1 %v627_v17, %s1619_s13  ;;  %v613_v21 = vld [vmem:[%s1706_s8 + $0x18] sm:$0xff]  ;;  %v630_v57 = vld [vmem:[%s1734_s11 + $0x20] sm:$0xff]  ;;  %v616_v58 = vld [vmem:[%s1706_s8 + $0x30] sm:$0xff] }
  0x17   : > { %786 = vrot.lane.b32.xlu0 %v626_v18, %s1619_s13  ;;  %v629_v23 = vld [vmem:[%s1734_s11 + $0x18] sm:$0xff]  ;;  %v631_v59 = vld [vmem:[%s1734_s11 + $0x28] sm:$0xff]  ;;  %v632_v60 = vld [vmem:[%s1734_s11 + $0x30] sm:$0xff] }
  0x18   : > { %1519 = vmatmul.mubr.msk.f32.gmra.mxu0 %vm316_vm1, %v1739_v13  ;;  %v617_v62 = vld [vmem:[%s1706_s8 + $0x38] sm:$0xff]  ;;  %v619_v11 = vld [vmem:[%s1706_s8 + $0x48] sm:$0xff]  ;;  %v618_v12 = vld [vmem:[%s1706_s8 + $0x40] sm:$0xff] }
  0x19   : > { %1531 = vmatmul.mubr.msk.f32.gmra.mxu1 %vm316_vm1, %v1744_v14  ;;  %1521 = vmatprep.mubr.msk.f32.mxu0 %vm316_vm1, %v1747_v15  ;;  %v633_v0 = vld [vmem:[%s1734_s11 + $0x38] sm:$0xff]  ;;  %v635_v17 = vld [vmem:[%s1734_s11 + $0x48] sm:$0xff]  ;;  %v634_v18 = vld [vmem:[%s1734_s11 + $0x40] sm:$0xff] }
  0x1a   : > { %1533 = vmatprep.mubr.msk.f32.mxu1 %vm316_vm1, %v1750_v16  ;;  %728 = vrot.lane.b32.xlu1 %v613_v21, %s1618_s12  ;;  %v621_v21 = vld [vmem:[%s1706_s8 + $0x58] sm:$0xff] }
  0x1b   : > { %726 = vrot.lane.b32.xlu0 %v612_v22, %s1618_s12  ;;  %v620_v22 = vld [vmem:[%s1706_s8 + $0x50] sm:$0xff] }
  0x1c   : > { %1522 = vmatmul.mubr.msk.f32.gmra.mxu0 %vm316_vm1, %v1763_v19 }
  0x1d   : > { %1534 = vmatmul.mubr.msk.f32.gmra.mxu1 %vm316_vm1, %v1768_v20 }
  0x1e   : > { %792 = vrot.lane.b32.xlu1 %v629_v23, %s1619_s13  ;;  %v637_v23 = vld [vmem:[%s1734_s11 + $0x58] sm:$0xff] }
  0x1f   : > { %790 = vrot.lane.b32.xlu0 %v628_v24, %s1619_s13  ;;  %v636_v24 = vld [vmem:[%s1734_s11 + $0x50] sm:$0xff] }
  0x22   : > { %732 = vrot.lane.b32.xlu1 %v615_v25, %s1618_s12 }
  0x23   : > { %730 = vrot.lane.b32.xlu0 %v614_v26, %s1618_s12 }
  0x84   : > { %v1880_v25 = vpop.permute.xlu1 %724 }
  0x85   : > { %v1882_v26 = vpop.permute.xlu0 %722 }
  0xd0   : > { %v1514_v27 = vpop.f32.mrf.mxu0 }
  0xd1   : > { %v1526_v28 = vpop.f32.mrf.mxu1  ;;  %v1788_v29 = vmul.f32 0.25, %v1514_v27  ;;  %v1884_v27 = vpop.permute.xlu1 %788 }
  0xd2   : > { %v1790_v30 = vmul.f32 0.25, %v1526_v28  ;;  %v435_v31 = vpop.f32.mrf.mxu0  ;;  %v1886_v28 = vpop.permute.xlu0 %786 }
  0xd3   : > { %548 = vrot.lane.b32.xlu0 %v1788_v29, %s1620_s14  ;;  %v475_v32 = vpop.f32.mrf.mxu1  ;;  %v1796_v34 = vmul.f32 0.25, %v435_v31 }
  0xd4   : > { %564 = vrot.lane.b32.xlu1 %v1790_v30, %s1620_s14  ;;  %v1517_v33 = vpop.f32.mrf.mxu0  ;;  %v1806_v40 = vmul.f32 0.25, %v475_v32 }
  0xd5   : > { %v1798_v35 = vmul.f32 0.25, %v1517_v33  ;;  %v1529_v37 = vpop.f32.mrf.mxu1  ;;  %v1888_v31 = vpop.permute.xlu1 %728 }
  0xd6   : > { %v445_v36 = vpop.f32.mrf.mxu0  ;;  %v1800_v38 = vmul.f32 0.25, %v1529_v37  ;;  %v1890_v32 = vpop.permute.xlu0 %726  ;;  %v885_v37 = vld [vmem:[%s2150_s4 + $0x8] sm:$0xff] }
  0xd7   : > { %546 = vrot.lane.b32.xlu0 %v1796_v34, %s1620_s14  ;;  %v485_v41 = vpop.f32.mrf.mxu1  ;;  %v1812_v44 = vmul.f32 0.25, %v445_v36  ;;  %1536 = vmatprep.subr.mxu1 %v885_v37 }
  0xd8   : > { %552 = vrot.lane.b32.xlu1 %v1798_v35, %s1620_s14  ;;  %v1520_v39 = vpop.f32.mrf.mxu0  ;;  %v1814_v45 = vmul.f32 0.25, %v485_v41  ;;  %1537 = vmatpush3.msra.mxu1 %v885_v37  ;;  %v622_v37 = vld [vmem:[%s1706_s8 + $0x60] sm:$0xff] }
  0xd9   : > { %v1532_v43 = vpop.f32.mrf.mxu1  ;;  %v1816_v46 = vmul.f32 0.25, %v1520_v39  ;;  %v1892_v33 = vpop.permute.xlu1 %792 }
  0xda   : > { %v455_v42 = vpop.f32.mrf.mxu0  ;;  %v1824_v50 = vmul.f32 0.25, %v1532_v43  ;;  %v1894_v36 = vpop.permute.xlu0 %790 }
  0xdb   : > { %562 = vrot.lane.b32.xlu0 %v1806_v40, %s1620_s14  ;;  %v1822_v47 = vmul.f32 0.25, %v455_v42  ;;  %v495_v48 = vpop.f32.mrf.mxu1  ;;  %v884_v42 = vld [vmem:[%s2150_s4] sm:$0xff] }
  0xdc   : > { %568 = vrot.lane.b32.xlu1 %v1800_v38, %s1620_s14  ;;  %v1523_v49 = vpop.f32.mrf.mxu0  ;;  %v1830_v51 = vmul.f32 0.25, %v495_v48  ;;  %1538 = vmatprep.subr.mxu1 %v884_v42 }
  0xdd   : > { %v1832_v53 = vmul.f32 0.25, %v1523_v49  ;;  %v1535_v55 = vpop.f32.mrf.mxu1  ;;  %v1899_v39 = vpop.permute.xlu1 %732  ;;  %1539 = vmatpush3.msra.mxu1 %v884_v42 }
  0xde   : > { %v465_v52 = vpop.f32.mrf.mxu0  ;;  %v1844_v56 = vmul.f32 0.25, %v1535_v55  ;;  %v1901_v41 = vpop.permute.xlu0 %730 }
  0xdf   : > { %566 = vrot.lane.b32.xlu0 %v1814_v45, %s1620_s14  ;;  %v1838_v54 = vmul.f32 0.25, %v465_v52  ;;  %v505_v61 = vpop.f32.mrf.mxu1 }
  0xe0   : > { %550 = vrot.lane.b32.xlu1 %v1812_v44, %s1620_s14  ;;  %v1857_v63 = vmul.f32 0.25, %v505_v61 }
  0xe3   : > { %554 = vrot.lane.b32.xlu0 %v1822_v47, %s1620_s14 }
  0xe4   : > { %556 = vrot.lane.b32.xlu1 %v1816_v46, %s1620_s14 }
  0xe7   : > { %570 = vrot.lane.b32.xlu0 %v1830_v51, %s1620_s14 }
  0xe8   : > { %572 = vrot.lane.b32.xlu1 %v1824_v50, %s1620_s14 }
  0xeb   : > { %558 = vrot.lane.b32.xlu0 %v1838_v54, %s1620_s14 }
  0xec   : > { %560 = vrot.lane.b32.xlu1 %v1832_v53, %s1620_s14 }
  0xef   : > { %794 = vrot.lane.b32.xlu0 %v630_v57, %s1619_s13 }
  0xf0   : > { %576 = vrot.lane.b32.xlu1 %v1844_v56, %s1620_s14 }
  0xf3   : > { %734 = vrot.lane.b32.xlu0 %v616_v58, %s1618_s12 }
  0xf4   : > { %796 = vrot.lane.b32.xlu1 %v631_v59, %s1619_s13 }
  0xf7   : > { %798 = vrot.lane.b32.xlu0 %v632_v60, %s1619_s13 }
  0xf8   : > { %736 = vrot.lane.b32.xlu1 %v617_v62, %s1618_s12 }
  0xfb   : > { %574 = vrot.lane.b32.xlu0 %v1857_v63, %s1620_s14 }
  0xfc   : > { %800 = vrot.lane.b32.xlu1 %v633_v0, %s1619_s13 }
  0xff   : > { %738 = vrot.lane.b32.xlu0 %v618_v12, %s1618_s12 }
 0x100   : > { %740 = vrot.lane.b32.xlu1 %v619_v11, %s1618_s12 }
 0x103   : > { %802 = vrot.lane.b32.xlu0 %v634_v18, %s1619_s13 }
 0x104   : > { %804 = vrot.lane.b32.xlu1 %v635_v17, %s1619_s13 }
 0x107   : > { %742 = vrot.lane.b32.xlu0 %v620_v22, %s1618_s12 }
 0x108   : > { %744 = vrot.lane.b32.xlu1 %v621_v21, %s1618_s12 }
 0x10b   : > { %806 = vrot.lane.b32.xlu0 %v636_v24, %s1619_s13 }
 0x10c   : > { %808 = vrot.lane.b32.xlu1 %v637_v23, %s1619_s13 }
 0x145   : > { %v549_v48 = vpop.permute.xlu0 %548 }
 0x146   : > { %v565_v43 = vpop.permute.xlu1 %564  ;;  %v595_v49 = vmul.f32 %v549_v48, %v1788_v29  ;;  %v625_v48 = vld [vmem:[%s1706_s8 + $0x78] sm:$0xff] }
 0x147   : > { %v603_v57 = vmul.f32 %v565_v43, %v1790_v30  ;;  %v638_v43 = vld [vmem:[%s1734_s11 + $0x60] sm:$0xff] }
 0x148   : > { %660 = vrot.lane.b32.xlu1 %v595_v49, %s1621_s19  ;;  %v624_v49 = vld [vmem:[%s1706_s8 + $0x70] sm:$0xff] }
 0x149   : > { %v547_v52 = vpop.permute.xlu0 %546 }
 0x14a   : > { %v553_v55 = vpop.permute.xlu1 %552  ;;  %v594_v58 = vmul.f32 %v547_v52, %v1796_v34  ;;  %v1099_v52 = vld [vmem:[%s2151_s5 + $0x18] sm:$0xff] }
 0x14b   : > { %v597_v61 = vmul.f32 %v553_v55, %v1798_v35  ;;  %1564 = vmatprep.subr.mxu0 %v1099_v52 }
 0x14c   : > { %676 = vrot.lane.b32.xlu1 %v603_v57, %s1621_s19  ;;  %658 = vrot.lane.b32.xlu0 %v594_v58, %s1621_s19  ;;  %v641_v57 = vld [vmem:[%s1734_s11 + $0x78] sm:$0xff]  ;;  %v640_v58 = vld [vmem:[%s1734_s11 + $0x70] sm:$0xff] }
 0x14d   : > { %v563_v59 = vpop.permute.xlu0 %562  ;;  %1565 = vmatpush3.msra.mxu0 %v1099_v52 }
 0x14e   : > { %v569_v60 = vpop.permute.xlu1 %568  ;;  %v602_v62 = vmul.f32 %v563_v59, %v1806_v40 }
 0x14f   : > { %v605_v30 = vmul.f32 %v569_v60, %v1800_v38 }
 0x150   : > { %664 = vrot.lane.b32.xlu1 %v597_v61, %s1621_s19  ;;  %674 = vrot.lane.b32.xlu0 %v602_v62, %s1621_s19 }
 0x151   : > { %v567_v29 = vpop.permute.xlu0 %566 }
 0x152   : > { %v551_v0 = vpop.permute.xlu1 %550  ;;  %v604_v35 = vmul.f32 %v567_v29, %v1814_v45 }
 0x153   : > { %v596_v34 = vmul.f32 %v551_v0, %v1812_v44 }
 0x154   : > { %680 = vrot.lane.b32.xlu1 %v605_v30, %s1621_s19 }
 0x155   : > { %662 = vrot.lane.b32.xlu0 %v596_v34, %s1621_s19  ;;  %v555_v12 = vpop.permute.xlu0 %554 }
 0x156   : > { %v557_v11 = vpop.permute.xlu1 %556  ;;  %v598_v38 = vmul.f32 %v555_v12, %v1822_v47 }
 0x157   : > { %v599_v40 = vmul.f32 %v557_v11, %v1816_v46 }
 0x159   : > { %668 = vrot.lane.b32.xlu1 %v599_v40, %s1621_s19  ;;  %678 = vrot.lane.b32.xlu0 %v604_v35, %s1621_s19  ;;  %v571_v18 = vpop.permute.xlu0 %570 }
 0x15a   : > { %v573_v17 = vpop.permute.xlu1 %572  ;;  %v606_v46 = vmul.f32 %v571_v18, %v1830_v51  ;;  %v639_v51 = vld [vmem:[%s1734_s11 + $0x68] sm:$0xff] }
 0x15b   : > { %v607_v44 = vmul.f32 %v573_v17, %v1824_v50  ;;  %v623_v50 = vld [vmem:[%s1706_s8 + $0x68] sm:$0xff]  ;;  %s2109_s8 = scalar_lea.vmem %s2152_s6, %s1668_s26 }
 0x15d   : > { %684 = vrot.lane.b32.xlu1 %v607_v44, %s1621_s19  ;;  %666 = vrot.lane.b32.xlu0 %v598_v38, %s1621_s19  ;;  %v559_v21 = vpop.permute.xlu0 %558 }
 0x15e   : > { %v561_v45 = vpop.permute.xlu1 %560  ;;  %v600_v23 = vmul.f32 %v559_v21, %v1838_v54 }
 0x15f   : > { %v601_v22 = vmul.f32 %v561_v45, %v1832_v53 }
 0x161   : > { %672 = vrot.lane.b32.xlu1 %v601_v22, %s1621_s19  ;;  %682 = vrot.lane.b32.xlu0 %v606_v46, %s1621_s19  ;;  %v1932_v47 = vpop.permute.xlu0 %794 }
 0x162   : > { %v577_v53 = vpop.permute.xlu1 %576 }
 0x163   : > { %v609_v54 = vmul.f32 %v577_v53, %v1844_v56 }
 0x165   : > { %748 = vrot.lane.b32.xlu1 %v623_v50, %s1618_s12  ;;  %670 = vrot.lane.b32.xlu0 %v600_v23, %s1621_s19  ;;  %v1938_v24 = vpop.permute.xlu0 %734 }
 0x166   : > { %v797_v59 = vpop.permute.xlu1 %796 }
 0x169   : > { %812 = vrot.lane.b32.xlu1 %v639_v51, %s1619_s13  ;;  %746 = vrot.lane.b32.xlu0 %v622_v37, %s1618_s12  ;;  %v1944_v42 = vpop.permute.xlu0 %798 }
 0x16a   : > { %v737_v60 = vpop.permute.xlu1 %736 }
 0x16d   : > { %688 = vrot.lane.b32.xlu1 %v609_v54, %s1621_s19  ;;  %810 = vrot.lane.b32.xlu0 %v638_v43, %s1619_s13  ;;  %v575_v55 = vpop.permute.xlu0 %574 }
 0x16e   : > { %v608_v56 = vmul.f32 %v575_v55, %v1857_v63  ;;  %v1963_v61 = vpop.permute.xlu1 %800 }
 0x171   : > { %752 = vrot.lane.b32.xlu1 %v625_v48, %s1618_s12  ;;  %750 = vrot.lane.b32.xlu0 %v624_v49, %s1618_s12  ;;  %v739_v29 = vpop.permute.xlu0 %738 }
 0x172   : > { %v1965_v62 = vpop.permute.xlu1 %740 }
 0x175   : > { %816 = vrot.lane.b32.xlu1 %v641_v57, %s1619_s13  ;;  %686 = vrot.lane.b32.xlu0 %v608_v56, %s1621_s19  ;;  %v1969_v30 = vpop.permute.xlu0 %802 }
 0x176   : > { %v1967_v0 = vpop.permute.xlu1 %804 }
 0x179   : > { %814 = vrot.lane.b32.xlu0 %v640_v58, %s1619_s13  ;;  %v1973_v63 = vpop.permute.xlu0 %742 }
 0x17a   : > { %v1971_v34 = vpop.permute.xlu1 %744 }
 0x17d   : > { %v1977_v12 = vpop.permute.xlu0 %806 }
 0x17e   : > { %v1975_v11 = vpop.permute.xlu1 %808 }
 0x1ba   : > { %v661_v35 = vpop.permute.xlu1 %660 }
 0x1bb   : > { %v835_v40 = vsel %vm316_vm1, %v1683_v3, %v661_v35 }
 0x1bc   : > { %v852_v38 = vsel %vm850_vm2, %v835_v40, %v1880_v25 }
 0x1bd   : > { %v869_v46 = vsel %vm867_vm3, %v852_v38, %v1884_v27 }
 0x1be   : > { %v677_v17 = vpop.permute.xlu1 %676  ;;  %v659_v18 = vpop.permute.xlu0 %658 }
 0x1bf   : > { %v834_v44 = vsel %vm316_vm1, %v1677_v1, %v659_v18  ;;  %v843_v55 = vsel %vm316_vm1, %v1690_v4, %v677_v17 }
 0x1c0   : > { %v851_v45 = vsel %vm850_vm2, %v834_v44, %v1882_v26  ;;  %v860_v4 = vsel %vm850_vm2, %v843_v55, %v1965_v62 }
 0x1c1   : > { %v868_v21 = vsel %vm867_vm3, %v851_v45, %v1886_v28 }
 0x1c2   : > { %v665_v3 = vpop.permute.xlu1 %664  ;;  %1540 = vmatprep.mubr.msk.f32.mxu1 %vm886_vm4, %v868_v21  ;;  %v675_v22 = vpop.permute.xlu0 %674 }
 0x1c3   : > { %1541 = vmatmul.mubr.msk.f32.vlgmr.msra.gmra.mxu1 %vm886_vm4, %v869_v46  ;;  %v837_v25 = vsel %vm316_vm1, %v1711_v7, %v665_v3 }
 0x1c4   : > { %v854_v26 = vsel %vm850_vm2, %v837_v25, %v1888_v31 }
 0x1c5   : > { %v871_v7 = vsel %vm867_vm3, %v854_v26, %v1892_v33 }
 0x1c6   : > { %v681_v1 = vpop.permute.xlu1 %680 }
 0x1c7   : > { %v663_v50 = vpop.permute.xlu0 %662 }
 0x1c8   : > { %v836_v28 = vsel %vm316_vm1, %v1693_v5, %v663_v50 }
 0x1c9   : > { %v853_v27 = vsel %vm850_vm2, %v836_v28, %v1890_v32 }
 0x1ca   : > { %v870_v23 = vsel %vm867_vm3, %v853_v27, %v1894_v36 }
 0x1cb   : > { %v669_v51 = vpop.permute.xlu1 %668  ;;  %1543 = vmatprep.mubr.msk.f32.mxu1 %vm886_vm4, %v870_v23  ;;  %v679_v37 = vpop.permute.xlu0 %678 }
 0x1cc   : > { %1544 = vmatmul.mubr.msk.f32.gmra.mxu1 %vm886_vm4, %v871_v7  ;;  %v839_v31 = vsel %vm316_vm1, %v1739_v13, %v669_v51 }
 0x1cd   : > { %v856_v32 = vsel %vm850_vm2, %v839_v31, %v1899_v39 }
 0x1ce   : > { %v873_v13 = vsel %vm867_vm3, %v856_v32, %v797_v59 }
 0x1cf   : > { %v685_v53 = vpop.permute.xlu1 %684  ;;  %v667_v5 = vpop.permute.xlu0 %666 }
 0x1d0   : > { %v838_v36 = vsel %vm316_vm1, %v1719_v9, %v667_v5  ;;  %v842_v9 = vsel %vm316_vm1, %v1680_v2, %v675_v22  ;;  %v1096_v22 = vld [vmem:[%s2151_s5] sm:$0xff] }
 0x1d1   : > { %v855_v43 = vsel %vm850_vm2, %v838_v36, %v1901_v41  ;;  %v859_v57 = vsel %vm850_vm2, %v842_v9, %v739_v29 }
 0x1d2   : > { %v872_v54 = vsel %vm867_vm3, %v855_v43, %v1932_v47 }
 0x1d3   : > { %v673_v33 = vpop.permute.xlu1 %672  ;;  %1546 = vmatprep.mubr.msk.f32.mxu1 %vm886_vm4, %v872_v54  ;;  %v683_v48 = vpop.permute.xlu0 %682 }
 0x1d4   : > { %1547 = vmatmul.mubr.msk.f32.gmra.mxu1 %vm886_vm4, %v873_v13  ;;  %v841_v39 = vsel %vm316_vm1, %v1763_v19, %v673_v33  ;;  %v844_v19 = vsel %vm316_vm1, %v1700_v6, %v679_v37  ;;  %v845_v6 = vsel %vm316_vm1, %v1716_v8, %v681_v1  ;;  %v846_v8 = vsel %vm316_vm1, %v1722_v10, %v683_v48 }
 0x1d5   : > { %v858_v41 = vsel %vm850_vm2, %v841_v39, %v737_v60  ;;  %v862_v62 = vsel %vm850_vm2, %v845_v6, %v1971_v34  ;;  %v847_v34 = vsel %vm316_vm1, %v1744_v14, %v685_v53 }
 0x1d6   : > { %v879_v40 = vsel %vm867_vm3, %v862_v62, %v1975_v11 }
 0x1d7   : > { %v749_v49 = vpop.permute.xlu1 %748  ;;  %v671_v52 = vpop.permute.xlu0 %670 }
 0x1d8   : > { %v840_v47 = vsel %vm316_vm1, %v1747_v15, %v671_v52  ;;  %v875_v15 = vsel %vm867_vm3, %v858_v41, %v1963_v61  ;;  %v877_v61 = vsel %vm867_vm3, %v860_v4, %v1967_v0 }
 0x1d9   : > { %v857_v56 = vsel %vm850_vm2, %v840_v47, %v1938_v24  ;;  %v876_v24 = vsel %vm867_vm3, %v859_v57, %v1969_v30 }
 0x1da   : > { %v874_v2 = vsel %vm867_vm3, %v857_v56, %v1944_v42  ;;  %v861_v42 = vsel %vm850_vm2, %v844_v19, %v1973_v63 }
 0x1db   : > { %v813_v58 = vpop.permute.xlu1 %812  ;;  %1549 = vmatprep.mubr.msk.f32.mxu1 %vm886_vm4, %v874_v2  ;;  %v747_v59 = vpop.permute.xlu0 %746  ;;  %v878_v30 = vsel %vm867_vm3, %v861_v42, %v1977_v12  ;;  %v864_v12 = vsel %vm850_vm2, %v847_v34, %v749_v49 }
 0x1dc   : > { %1550 = vmatmul.mubr.msk.f32.gmra.mxu1 %vm886_vm4, %v875_v15  ;;  %v863_v63 = vsel %vm850_vm2, %v846_v8, %v747_v59  ;;  %v881_v10 = vsel %vm867_vm3, %v864_v12, %v813_v58 }
 0x1dd   : > { %1552 = vmatprep.mubr.msk.f32.mxu1 %vm886_vm4, %v876_v24 }
 0x1df   : > { %v689_v60 = vpop.permute.xlu1 %688  ;;  %v811_v29 = vpop.permute.xlu0 %810 }
 0x1e0   : > { %1553 = vmatmul.mubr.msk.f32.gmra.mxu1 %vm886_vm4, %v877_v61  ;;  %v880_v0 = vsel %vm867_vm3, %v863_v63, %v811_v29  ;;  %v849_v44 = vsel %vm316_vm1, %v1768_v20, %v689_v60  ;;  %v1097_v20 = vld [vmem:[%s2151_s5 + $0x8] sm:$0xff] }
 0x1e1   : > { %1555 = vmatprep.mubr.msk.f32.mxu1 %vm886_vm4, %v878_v30 }
 0x1e3   : > { %v751_v35 = vpop.permute.xlu0 %750  ;;  %v753_v17 = vpop.permute.xlu1 %752 }
 0x1e4   : > { %1556 = vmatmul.mubr.msk.f32.gmra.mxu1 %vm886_vm4, %v879_v40  ;;  %v866_v14 = vsel %vm850_vm2, %v849_v44, %v753_v17 }
 0x1e5   : > { %1558 = vmatprep.mubr.msk.f32.mxu1 %vm886_vm4, %v880_v0 }
 0x1e7   : > { %v687_v18 = vpop.permute.xlu0 %686  ;;  %v817_v11 = vpop.permute.xlu1 %816 }
 0x1e8   : > { %v848_v38 = vsel %vm316_vm1, %v1750_v16, %v687_v18  ;;  %1559 = vmatmul.mubr.msk.f32.gmra.mxu1 %vm886_vm4, %v881_v10  ;;  %v883_v3 = vsel %vm867_vm3, %v866_v14, %v817_v11  ;;  %v1098_v16 = vld [vmem:[%s2151_s5 + $0x10] sm:$0xff] }
 0x1e9   : > { %v865_v45 = vsel %vm850_vm2, %v848_v38, %v751_v35  ;;  %1566 = vmatprep.subr.mxu0 %v1098_v16 }
 0x1ea   : > { %1567 = vmatpush3.msra.mxu0 %v1098_v16 }
 0x1eb   : > { %v815_v21 = vpop.permute.xlu0 %814  ;;  %1568 = vmatprep.subr.mxu0 %v1097_v20 }
 0x1ec   : > { %v882_v46 = vsel %vm867_vm3, %v865_v45, %v815_v21  ;;  %1569 = vmatpush3.msra.mxu0 %v1097_v20 }
 0x1ed   : > { %1561 = vmatprep.mubr.msk.f32.mxu1 %vm886_vm4, %v882_v46  ;;  %1570 = vmatprep.subr.mxu0 %v1096_v22 }
 0x1ee   : > { %1562 = vmatmul.mubr.msk.f32.gmra.mxu1 %vm886_vm4, %v883_v3  ;;  %1571 = vmatpush3.msra.mxu0 %v1096_v22 }
 0x283   : > { %v1542_v25 = vpop.f32.mrf.mxu1 }
 0x284   : > { %v1081_v26 = vmax.f32 %v1542_v25, 0.0 }
 0x285   : > { %v1001_v1 = vpop.f32.mrf.mxu1 }
 0x286   : > { %v1080_v50 = vmax.f32 %v1001_v1, 0.0 }
 0x288   : > { %1572 = vmatprep.mubr.msk.f32.mxu0 %vm1100_vm5, %v1080_v50 }
 0x289   : > { %1573 = vmatmul.mubr.msk.f32.vlgmr.msra.gmra.mxu0 %vm1100_vm5, %v1081_v26 }
 0x28c   : > { %v1545_v28 = vpop.f32.mrf.mxu1 }
 0x28d   : > { %v1083_v51 = vmax.f32 %v1545_v28, 0.0 }
 0x28e   : > { %v1011_v27 = vpop.f32.mrf.mxu1 }
 0x28f   : > { %v1082_v23 = vmax.f32 %v1011_v27, 0.0 }
 0x291   : > { %1575 = vmatprep.mubr.msk.f32.mxu0 %vm1100_vm5, %v1082_v23 }
 0x292   : > { %1576 = vmatmul.mubr.msk.f32.gmra.mxu0 %vm1100_vm5, %v1083_v51 }
 0x294   : > { %v1548_v37 = vpop.f32.mrf.mxu1 }
 0x295   : > { %v1085_v53 = vmax.f32 %v1548_v37, 0.0 }
 0x296   : > { %v1021_v7 = vpop.f32.mrf.mxu1 }
 0x297   : > { %v1084_v31 = vmax.f32 %v1021_v7, 0.0 }
 0x299   : > { %1578 = vmatprep.mubr.msk.f32.mxu0 %vm1100_vm5, %v1084_v31 }
 0x29a   : > { %1579 = vmatmul.mubr.msk.f32.gmra.mxu0 %vm1100_vm5, %v1085_v53 }
 0x29c   : > { %v1551_v5 = vpop.f32.mrf.mxu1 }
 0x29d   : > { %v1087_v43 = vmax.f32 %v1551_v5, 0.0 }
 0x29e   : > { %v1031_v32 = vpop.f32.mrf.mxu1 }
 0x29f   : > { %v1086_v36 = vmax.f32 %v1031_v32, 0.0 }
 0x2a0   : > { %v1554_v54 = vpop.f32.mrf.mxu1 }
 0x2a1   : > { %1581 = vmatprep.mubr.msk.f32.mxu0 %vm1100_vm5, %v1086_v36  ;;  %v1089_v13 = vmax.f32 %v1554_v54, 0.0 }
 0x2a2   : > { %v1041_v33 = vpop.f32.mrf.mxu1  ;;  %1582 = vmatmul.mubr.msk.f32.gmra.mxu0 %vm1100_vm5, %v1087_v43 }
 0x2a3   : > { %v1088_v48 = vmax.f32 %v1041_v33, 0.0 }
 0x2a4   : > { %v1557_v39 = vpop.f32.mrf.mxu1 }
 0x2a5   : > { %1584 = vmatprep.mubr.msk.f32.mxu0 %vm1100_vm5, %v1088_v48  ;;  %v1091_v52 = vmax.f32 %v1557_v39, 0.0 }
 0x2a6   : > { %v1051_v9 = vpop.f32.mrf.mxu1  ;;  %1585 = vmatmul.mubr.msk.f32.gmra.mxu0 %vm1100_vm5, %v1089_v13 }
 0x2a7   : > { %v1090_v49 = vmax.f32 %v1051_v9, 0.0 }
 0x2a8   : > { %v1560_v41 = vpop.f32.mrf.mxu1 }
 0x2a9   : > { %1587 = vmatprep.mubr.msk.f32.mxu0 %vm1100_vm5, %v1090_v49  ;;  %v1093_v57 = vmax.f32 %v1560_v41, 0.0 }
 0x2aa   : > { %v1061_v47 = vpop.f32.mrf.mxu1  ;;  %1588 = vmatmul.mubr.msk.f32.gmra.mxu0 %vm1100_vm5, %v1091_v52 }
 0x2ab   : > { %v1092_v55 = vmax.f32 %v1061_v47, 0.0 }
 0x2ad   : > { %1590 = vmatprep.mubr.msk.f32.mxu0 %vm1100_vm5, %v1092_v55 }
 0x2ae   : > { %v1563_v56 = vpop.f32.mrf.mxu1  ;;  %1591 = vmatmul.mubr.msk.f32.gmra.mxu0 %vm1100_vm5, %v1093_v57 }
 0x2af   : > { %v1095_v58 = vmax.f32 %v1563_v56, 0.0 }
 0x2b0   : > { %v1071_v19 = vpop.f32.mrf.mxu1 }
 0x2b1   : > { %v1094_v2 = vmax.f32 %v1071_v19, 0.0 }
 0x2b3   : > { %1593 = vmatprep.mubr.msk.f32.mxu0 %vm1100_vm5, %v1094_v2 }
 0x2b4   : > { %1594 = vmatmul.mubr.msk.f32.gmra.mxu0 %vm1100_vm5, %v1095_v58 }
 0x349   : > { %v1574_v59 = vpop.f32.mrf.mxu0 }
 0x34a   : > { %1296 = vst.msk [vmem:[%s2109_s8 + $0x8] sm:$0xff] %vm1294_vm6, %v1574_v59 }
 0x34b   : > { %v1215_v15 = vpop.f32.mrf.mxu0 }
 0x34c   : > { %1295 = vst.msk [vmem:[%s2109_s8] sm:$0xff] %vm1294_vm6, %v1215_v15 }
 0x352   : > { %v1577_v4 = vpop.f32.mrf.mxu0 }
 0x353   : > { %1298 = vst.msk [vmem:[%s2109_s8 + $0x18] sm:$0xff] %vm1294_vm6, %v1577_v4 }
 0x354   : > { %v1225_v24 = vpop.f32.mrf.mxu0 }
 0x355   : > { %1297 = vst.msk [vmem:[%s2109_s8 + $0x10] sm:$0xff] %vm1294_vm6, %v1225_v24 }
 0x35a   : > { %v1580_v6 = vpop.f32.mrf.mxu0 }
 0x35b   : > { %1300 = vst.msk [vmem:[%s2109_s8 + $0x28] sm:$0xff] %vm1294_vm6, %v1580_v6 }
 0x35c   : > { %v1235_v42 = vpop.f32.mrf.mxu0 }
 0x35d   : > { %1299 = vst.msk [vmem:[%s2109_s8 + $0x20] sm:$0xff] %vm1294_vm6, %v1235_v42 }
 0x362   : > { %v1583_v60 = vpop.f32.mrf.mxu0 }
 0x363   : > { %1302 = vst.msk [vmem:[%s2109_s8 + $0x38] sm:$0xff] %vm1294_vm6, %v1583_v60 }
 0x364   : > { %v1245_v29 = vpop.f32.mrf.mxu0 }
 0x365   : > { %1301 = vst.msk [vmem:[%s2109_s8 + $0x30] sm:$0xff] %vm1294_vm6, %v1245_v29 }
 0x366   : > { %v1586_v61 = vpop.f32.mrf.mxu0 }
 0x367   : > { %1304 = vst.msk [vmem:[%s2109_s8 + $0x48] sm:$0xff] %vm1294_vm6, %v1586_v61 }
 0x368   : > { %v1255_v62 = vpop.f32.mrf.mxu0 }
 0x369   : > { %1303 = vst.msk [vmem:[%s2109_s8 + $0x40] sm:$0xff] %vm1294_vm6, %v1255_v62 }
 0x36a   : > { %v1589_v30 = vpop.f32.mrf.mxu0 }
 0x36b   : > { %1306 = vst.msk [vmem:[%s2109_s8 + $0x58] sm:$0xff] %vm1294_vm6, %v1589_v30 }
 0x36c   : > { %v1265_v8 = vpop.f32.mrf.mxu0 }
 0x36d   : > { %1305 = vst.msk [vmem:[%s2109_s8 + $0x50] sm:$0xff] %vm1294_vm6, %v1265_v8 }
 0x36e   : > { %v1592_v63 = vpop.f32.mrf.mxu0 }
 0x36f   : > { %1308 = vst.msk [vmem:[%s2109_s8 + $0x68] sm:$0xff] %vm1294_vm6, %v1592_v63 }
 0x370   : > { %v1275_v35 = vpop.f32.mrf.mxu0 }
 0x371   : > { %1307 = vst.msk [vmem:[%s2109_s8 + $0x60] sm:$0xff] %vm1294_vm6, %v1275_v35 }
 0x374   : > { %v1595_v40 = vpop.f32.mrf.mxu0 }
 0x375   : > { %1310 = vst.msk [vmem:[%s2109_s8 + $0x78] sm:$0xff] %vm1294_vm6, %v1595_v40 }
 0x376   : > { %v1285_v0 = vpop.f32.mrf.mxu0 }
 0x377   : > { %1309 = vst.msk [vmem:[%s2109_s8 + $0x70] sm:$0xff] %vm1294_vm6, %v1285_v0 }
 0x378 PF: > { %s16_s21 = sadd.s32 1, %s1616_s21  }
 0x379   : > { %p13_p4 = scmp.ge.s32.totalorder %s16_s21, 4  }
 0x37b   :  { %15 = sbr.rel (!%p13_p4) target bundleno = 1 (0x1), region = 80 }

// kernel: g2n2_forward.5
= control target key start
LH: loop header
LB: loop body
LE: loop exit
PB: predicated region body
PF: predicated region fallthrough
CT: control target
= control target key end

     0   :  { %8 = vsyncpa [#allocation4], 0  ;;  %s708_s12 = smov 0   ;;  %s710_s13 = smov 0   ;;  %s840_s0 = inlined_call_operand.vmem [shape: f32[8,768], index: 0, kind: input, shape index: {}]   ;;  %s841_s1 = inlined_call_operand.vmem [shape: f32[768,128], index: 1, kind: input, shape index: {}]   ;;  %s842_s2 = inlined_call_operand.vmem [shape: f32[8,1], index: 2, kind: input, shape index: {}]   ;;  %s843_s3 = inlined_call_operand.hbm [shape: f32[8,128], index: 3, kind: output, shape index: {}]  }
   0x1   :  { %s712_s14 = smov 0  }
   0x2 LB: > { %s496_s15 = sadd.s32 4294967295, %s681_s14   ;;  %s23_s16 = sadd.s32 1, %s677_s13  ;;  %s681_s14 = sphi %s712_s14, %s14_s14   ;;  %s677_s13 = sphi %s710_s13, %s846_s13   ;;  %s673_s12 = sphi %s708_s12, %s845_s12  }
   0x3   : > { %p24_p0 = scmp.ge.s32.totalorder %s23_s16, 2  ;;  %p499_p1 = scmp.ge.s32.totalorder %s681_s14, 1 }
   0x4   : > { %p167_p2 = scmp.lt.s32.totalorder %s681_s14, 3 }
   0x5   : > { %s848_s16 = smov (%p24_p0, %s23_s16), 0 }
   0x6   : > { %p168_p3 = pnand %p499_p1, %p167_p2 }
   0x7   : > { %s194_s17 = smul.u32 (!%p168_p3), 3, %s673_s12  ;;  %p502_p6 = scmp.ne.s32.totalorder (!%p168_p3), %s673_s12, 0 }
   0x8   : > { %171 = sbr.rel (%p168_p3) target bundleno = 404 (0x194), region = 32 }
   0x9   : > { %s200_s18 = smul.u32 (!%p168_p3), 48, %s673_s12  ;;  %p195_p4 = scmp.lt.s32.totalorder (!%p168_p3), %s194_s17, 5 }
   0xb   : > { %p201_p5 = scmp.lt.s32.totalorder (!%p168_p3), %s200_s18, 95 }
   0xd   : > { %s850_s17 = smov (!%p195_p4, %s194_s17), 5  ;;  %s852_s18 = smov (!%p201_p5, %s200_s18), 95 }
   0xe   : > { %s500_s19 = sshll.u32 %s850_s17, 3  ;;  %s501_s23 = sshll.u32 %s852_s18, 3 }
   0xf   : > { %s734_s22 = scalar_lea.vmem %s840_s0, %s500_s19  ;;  %s739_s26 = scalar_lea.vmem %s841_s1, %s501_s23 }
  0x10   : > { %212 = sbr.rel (%p502_p6) target bundleno = 23 (0x17), region = 36 }
  0x15   : > { %v683_v0 = vmov 0.0  }
  0x16   : > { %213 = vst [vmem:[#allocation2] sm:$0xff] %v683_v0 }
  0x17 PF: > { %v249_v1 = vld [vmem:[%s739_s26 + $0xf8] sm:$0xff]  ;;  %v248_v3 = vld [vmem:[%s739_s26 + $0xf0] sm:$0xff]  ;;  %v684_v4 = vmov 0.0   ;;  %v247_v7 = vld [vmem:[%s739_s26 + $0xe8] sm:$0xff]  ;;  %vm685_vm0 = vmmov 0   ;;  %p503_p7 = scmp.ne.s32.totalorder %s673_s12, 1 }
  0x18   : > { %v233_v2 = vld [vmem:[%s739_s26 + $0x78] sm:$0xff]  ;;  %508 = vmatprep.subr.mxu0 %v249_v1  ;;  %560 = vmatprep.subr.mxu1 %v684_v4  ;;  %v232_v5 = vld [vmem:[%s739_s26 + $0x70] sm:$0xff]  ;;  %v231_v9 = vld [vmem:[%s739_s26 + $0x68] sm:$0xff] }
  0x19   : > { %v265_v6 = vld [vmem:[%s739_s26 + $0x178] sm:$0xff]  ;;  %509 = vmatpush3.msra.mxu0 %v233_v2  ;;  %v264_v8 = vld [vmem:[%s739_s26 + $0x170] sm:$0xff]  ;;  %v263_v10 = vld [vmem:[%s739_s26 + $0x168] sm:$0xff]  ;;  %592 = vmatprep.mubr.msk.f32.mxu1 %vm685_vm0, %v684_v4 }
  0x1a   : > { %561 = vmatpush3.msra.mxu1 %v265_v6  ;;  %510 = vmatprep.subr.mxu0 %v248_v3  ;;  %v246_v11 = vld [vmem:[%s739_s26 + $0xe0] sm:$0xff]  ;;  %v245_v14 = vld [vmem:[%s739_s26 + $0xd8] sm:$0xff]  ;;  %v244_v17 = vld [vmem:[%s739_s26 + $0xd0] sm:$0xff] }
  0x1b   : > { %562 = vmatprep.subr.mxu1 %v684_v4  ;;  %511 = vmatpush3.msra.mxu0 %v232_v5  ;;  %v230_v12 = vld [vmem:[%s739_s26 + $0x60] sm:$0xff]  ;;  %v229_v15 = vld [vmem:[%s739_s26 + $0x58] sm:$0xff]  ;;  %v228_v18 = vld [vmem:[%s739_s26 + $0x50] sm:$0xff] }
  0x1c   : > { %563 = vmatpush3.msra.mxu1 %v264_v8  ;;  %512 = vmatprep.subr.mxu0 %v247_v7  ;;  %v262_v13 = vld [vmem:[%s739_s26 + $0x160] sm:$0xff]  ;;  %v261_v16 = vld [vmem:[%s739_s26 + $0x158] sm:$0xff]  ;;  %v260_v19 = vld [vmem:[%s739_s26 + $0x150] sm:$0xff] }
  0x1d   : > { %564 = vmatprep.subr.mxu1 %v684_v4  ;;  %513 = vmatpush3.msra.mxu0 %v231_v9  ;;  %v243_v20 = vld [vmem:[%s739_s26 + $0xc8] sm:$0xff]  ;;  %v242_v23 = vld [vmem:[%s739_s26 + $0xc0] sm:$0xff]  ;;  %v241_v26 = vld [vmem:[%s739_s26 + $0xb8] sm:$0xff] }
  0x1e   : > { %565 = vmatpush3.msra.mxu1 %v263_v10  ;;  %514 = vmatprep.subr.mxu0 %v246_v11  ;;  %v227_v21 = vld [vmem:[%s739_s26 + $0x48] sm:$0xff]  ;;  %v226_v24 = vld [vmem:[%s739_s26 + $0x40] sm:$0xff]  ;;  %v225_v27 = vld [vmem:[%s739_s26 + $0x38] sm:$0xff] }
  0x1f   : > { %566 = vmatprep.subr.mxu1 %v684_v4  ;;  %515 = vmatpush3.msra.mxu0 %v230_v12  ;;  %v259_v22 = vld [vmem:[%s739_s26 + $0x148] sm:$0xff]  ;;  %v258_v25 = vld [vmem:[%s739_s26 + $0x140] sm:$0xff]  ;;  %v257_v28 = vld [vmem:[%s739_s26 + $0x138] sm:$0xff] }
  0x20   : > { %567 = vmatpush3.msra.mxu1 %v262_v13  ;;  %516 = vmatprep.subr.mxu0 %v245_v14  ;;  %v240_v29 = vld [vmem:[%s739_s26 + $0xb0] sm:$0xff]  ;;  %v239_v32 = vld [vmem:[%s739_s26 + $0xa8] sm:$0xff]  ;;  %v238_v35 = vld [vmem:[%s739_s26 + $0xa0] sm:$0xff] }
  0x21   : > { %568 = vmatprep.subr.mxu1 %v684_v4  ;;  %517 = vmatpush3.msra.mxu0 %v229_v15  ;;  %v224_v30 = vld [vmem:[%s739_s26 + $0x30] sm:$0xff]  ;;  %v223_v33 = vld [vmem:[%s739_s26 + $0x28] sm:$0xff]  ;;  %v222_v36 = vld [vmem:[%s739_s26 + $0x20] sm:$0xff] }
  0x22   : > { %569 = vmatpush3.msra.mxu1 %v261_v16  ;;  %518 = vmatprep.subr.mxu0 %v244_v17  ;;  %v256_v31 = vld [vmem:[%s739_s26 + $0x130] sm:$0xff]  ;;  %v255_v34 = vld [vmem:[%s739_s26 + $0x128] sm:$0xff]  ;;  %v254_v37 = vld [vmem:[%s739_s26 + $0x120] sm:$0xff] }
  0x23   : > { %570 = vmatprep.subr.mxu1 %v684_v4  ;;  %519 = vmatpush3.msra.mxu0 %v228_v18  ;;  %v237_v38 = vld [vmem:[%s739_s26 + $0x98] sm:$0xff]  ;;  %v236_v41 = vld [vmem:[%s739_s26 + $0x90] sm:$0xff]  ;;  %v235_v44 = vld [vmem:[%s739_s26 + $0x88] sm:$0xff] }
  0x24   : > { %571 = vmatpush3.msra.mxu1 %v260_v19  ;;  %520 = vmatprep.subr.mxu0 %v243_v20  ;;  %v221_v39 = vld [vmem:[%s739_s26 + $0x18] sm:$0xff]  ;;  %v220_v42 = vld [vmem:[%s739_s26 + $0x10] sm:$0xff]  ;;  %v219_v45 = vld [vmem:[%s739_s26 + $0x8] sm:$0xff] }
  0x25   : > { %572 = vmatprep.subr.mxu1 %v684_v4  ;;  %521 = vmatpush3.msra.mxu0 %v227_v21  ;;  %v253_v40 = vld [vmem:[%s739_s26 + $0x118] sm:$0xff]  ;;  %v252_v43 = vld [vmem:[%s739_s26 + $0x110] sm:$0xff]  ;;  %v216_v46 = vld [vmem:[%s734_s22 + $0x8] sm:$0xff] }
  0x26   : > { %573 = vmatpush3.msra.mxu1 %v259_v22  ;;  %522 = vmatprep.subr.mxu0 %v242_v23  ;;  %v234_v47 = vld [vmem:[%s739_s26 + $0x80] sm:$0xff]  ;;  %v251_v48 = vld [vmem:[%s739_s26 + $0x108] sm:$0xff]  ;;  %v217_v52 = vld [vmem:[%s734_s22 + $0x10] sm:$0xff] }
  0x27   : > { %574 = vmatprep.subr.mxu1 %v684_v4  ;;  %523 = vmatpush3.msra.mxu0 %v226_v24  ;;  %v218_v49 = vld [vmem:[%s739_s26] sm:$0xff] }
  0x28   : > { %575 = vmatpush3.msra.mxu1 %v258_v25  ;;  %524 = vmatprep.subr.mxu0 %v241_v26  ;;  %v215_v50 = vld [vmem:[%s734_s22] sm:$0xff] }
  0x29   : > { %576 = vmatprep.subr.mxu1 %v684_v4  ;;  %525 = vmatpush3.msra.mxu0 %v225_v27  ;;  %v250_v51 = vld [vmem:[%s739_s26 + $0x100] sm:$0xff] }
  0x2a   : > { %577 = vmatpush3.msra.mxu1 %v257_v28  ;;  %526 = vmatprep.subr.mxu0 %v240_v29  ;;  %v214_v57 = vld [vmem:[#allocation2] sm:$0xff] }
  0x2b   : > { %578 = vmatprep.subr.mxu1 %v684_v4  ;;  %527 = vmatpush3.msra.mxu0 %v224_v30 }
  0x2c   : > { %579 = vmatpush3.msra.mxu1 %v256_v31  ;;  %528 = vmatprep.subr.mxu0 %v239_v32 }
  0x2d   : > { %580 = vmatprep.subr.mxu1 %v684_v4  ;;  %529 = vmatpush3.msra.mxu0 %v223_v33 }
  0x2e   : > { %581 = vmatpush3.msra.mxu1 %v255_v34  ;;  %530 = vmatprep.subr.mxu0 %v238_v35 }
  0x2f   : > { %582 = vmatprep.subr.mxu1 %v684_v4  ;;  %531 = vmatpush3.msra.mxu0 %v222_v36 }
  0x30   : > { %583 = vmatpush3.msra.mxu1 %v254_v37  ;;  %532 = vmatprep.subr.mxu0 %v237_v38 }
  0x31   : > { %584 = vmatprep.subr.mxu1 %v684_v4  ;;  %533 = vmatpush3.msra.mxu0 %v221_v39 }
  0x32   : > { %585 = vmatpush3.msra.mxu1 %v253_v40  ;;  %534 = vmatprep.subr.mxu0 %v236_v41 }
  0x33   : > { %586 = vmatprep.subr.mxu1 %v684_v4  ;;  %535 = vmatpush3.msra.mxu0 %v220_v42 }
  0x34   : > { %587 = vmatpush3.msra.mxu1 %v252_v43  ;;  %536 = vmatprep.subr.mxu0 %v235_v44 }
  0x35   : > { %588 = vmatprep.subr.mxu1 %v684_v4  ;;  %537 = vmatpush3.msra.mxu0 %v219_v45 }
  0x36   : > { %330 = vmatprep.mubr.f32.mxu0 %v216_v46  ;;  %538 = vmatprep.subr.mxu0 %v234_v47 }
  0x37   : > { %589 = vmatpush3.msra.mxu1 %v251_v48  ;;  %539 = vmatpush3.msra.mxu0 %v218_v49 }
  0x38   : > { %590 = vmatprep.subr.mxu1 %v684_v4  ;;  %331 = vmatmul.mubr.f32.vlgmr.msra.gmra.mxu0 %v215_v50 }
  0x39   : > { %591 = vmatpush3.msra.mxu1 %v250_v51 }
  0x3a   : > { %593 = vmatmul.mubr.f32.vlgmr.msra.gmra.mxu1 %v217_v52 }
  0xf8   : > { %v540_v53 = vpop.f32.mrf.mxu0 }
  0xfa   : > { %v541_v54 = vpop.f32.mrf.mxu0  ;;  %v402_v55 = vpop.f32.mrf.mxu1 }
  0xfb   : > { %v542_v56 = vadd.f32 %v541_v54, %v540_v53 }
  0xfc   : > { %v594_v58 = vpop.f32.mrf.mxu1 }
  0xfd   : > { %v403_v59 = vadd.f32 %v542_v56, %v402_v55  ;;  %411 = sbr.rel (%p503_p7) target bundleno = 389 (0x185), region = 40 }
  0xff   : > { %v406_v60 = vadd.f32 %v403_v59, %v214_v57 }
 0x101   : > { %407 = vst [vmem:[#allocation2] sm:$0xff] %v406_v60 }
 0x102   : > { %v413_v61 = vld [vmem:[%s842_s2] sm:$0xff]  ;;  %v686_v62 = vmov 0  }
 0x103   : > { %630 = vset.pattern.permute.xlu0 %v686_v62 }
 0x104   : > { %416 = vperm.xlu0 %630, %v413_v61  }
 0x108   : > { %v412_v63 = vld [vmem:[#allocation2] sm:$0xff] }
 0x17f   : > { %v417_v0 = vpop.permute.xlu0 %416 }
 0x180   : > { %v419_v1 = vadd.f32 %v417_v0, %v412_v63 }
 0x182   : > { %v420_v2 = vmul.f32 0.25, %v419_v1 }
 0x184   : > { %421 = vst [vmem:[#allocation3] sm:$0xff] %v420_v2 }
 0x185 PF: > { %p816_p8 = scmp.eq.s32.totalorder %s496_s15, 1  ;;  %s687_s30 = smov [#allocation3]  }
 0x186   : > { %s431_s4 = sshll.u32 %s687_s30, 4  ;;  %s432_s4 = int_to_ptr.vmem [resolvable:$true] %s431_s4 }
 0x187   : > { %s631_s5 = scalar_lea.vmem %s432_s4, 128  ;;  %p638_p12 = scmp.lt.s32.totalorder %s432_s4, %s432_s4 }
 0x188   : > { %p632_p9 = scmp.ne.s32.totalorder %s432_s4, %s631_s5  ;;  %p639_p13 = scmp.lt.s32.totalorder %s631_s5, %s631_s5 }
 0x18a   : > { %p633_p10 = pnand %p632_p9, %p816_p8  ;;  %p640_p0 = por %p639_p13, %p638_p12 }
 0x18c   : > { %p634_p11 = pneg %p633_p10 }
 0x18e   : > { %p641_p1 = pnand %p640_p0, %p634_p11 }
 0x190   : > { %644 = shalt.err (!%p641_p1)
}
 0x191   : > { %596 = dma.vmem_to_hbm [thread:$0]  (%p816_p8), %s432_s4, 128, %s843_s3, [#allocation4]  }
 0x192   : > { %668 = dma.done.wait (%p816_p8), [#allocation4], 128  }
 0x193   : > { %670 = vsyncadd (%p816_p8), [#allocation4], 4294967168 }
 0x194 PF: > { %s14_s14 = sadd.s32 1, %s681_s14   ;;  %s845_s12 = smov %s677_s13 }
 0x195   : > { %p11_p2 = scmp.ge.s32.totalorder %s14_s14, 4   ;;  %s846_s13 = smov %s848_s16 }
 0x197   :  { %13 = sbr.rel (!%p11_p2) target bundleno = 2 (0x2), region = 71 }
 0x19c   :  { %444 = vsyncpa [#allocation4], 1 }
 0x19d   :  { %446 = vsyncpa [#allocation4 + $0x1], 1 }

</bundles_post_ra>
